<compile_context>
chip_gen: v7x
topology: tpu7x:2x2x1
jax: 0.10.0
libtpu: 0.0.40
codegen_flags: <defaults>
</compile_context>

<pallas_src>
import jax
import jax.numpy as jnp
from jax import lax
from jax.experimental import pallas as pl
from jax.experimental.pallas import tpu as pltpu


# ---------------------------------------------------------------------------
# Sub-pixel decomposition of nearest-upsample(2x) followed by 3x3 "same" conv.
#
# For output row i = 2a + ph (ph = parity), the three upsampled rows i-1, i, i+1
# map to original rows {a-1, a} (ph=0) or {a, a+1} (ph=1), with the 3 row-taps
# collapsing to 2 combined taps (same for columns).  So each of the 4 output
# parities is a 2x2 conv of the original-resolution (halo-padded) input with
# weights  wc[ph,pw,dh,dw] = sum_{kh,kw} A[ph,dh,kh] * A[pw,dw,kw] * w[kh,kw].
# ---------------------------------------------------------------------------
def _combined_weights(w):
    """w: (3, 3, Cin, Cout) HWIO -> (16, Cin, Cout) parity-combined taps."""
    A = jnp.array([[[1.0, 0.0, 0.0], [0.0, 1.0, 1.0]],    # even output rows/cols
                   [[1.0, 1.0, 0.0], [0.0, 0.0, 1.0]]],   # odd  output rows/cols
                  dtype=jnp.float32)                      # (parity, d, k)
    wc = jnp.einsum("pik,qjl,klcd->pqijcd", A, A, w.astype(jnp.float32))
    cin, cout = w.shape[2], w.shape[3]
    return wc.reshape(16, cin, cout)   # index = ((ph*2+pw)*2+dh)*2+dw


def _choose_row_tile(H, W, cin, cout, budget_bytes=12 * 1024 * 1024):
    """Largest divisor of H whose double-buffered in+out tiles fit the budget,
    preferring >= 2 row tiles so the grid can pipeline / feed both v7x cores."""
    def fits(th):
        in_b = (th + 2) * (W + 2) * cin * 4
        out_b = 4 * th * W * cout * 4
        return 2 * (in_b + out_b) <= budget_bytes
    divs = [d for d in range(1, H + 1) if H % d == 0 and fits(d)]
    if not divs:
        return 1
    small = [d for d in divs if d <= max(1, H // 2)]
    return max(small) if small else max(divs)


def _choose_ep_rows(total_rows, lane_elems, budget_bytes=8 * 1024 * 1024):
    """Largest multiple-of-8 proper divisor of total_rows whose f32 tiles
    (double-buffered in + out) fit the budget; falls back to the whole array."""
    best = total_rows
    for tr in range(8, total_rows, 8):
        if total_rows % tr == 0 and 4 * tr * lane_elems * 4 <= budget_bytes:
            best = tr
    return best


# ---------------------------------------------------------------------------
# Kernel 1: fused upsample(2x, nearest) + conv3x3("same") + BN partial stats.
#   xb_ref  : (1, TH, W+2, Cin)   body rows of halo-padded original input
#   xt0_ref : (1, 1,  W+2, Cin)   first halo row below the body
#   xt1_ref : (1, 1,  W+2, Cin)   second halo row below the body
#   wc_ref  : (16, Cin, Cout)     parity-combined weights
#   y_ref   : (1, 4, TH, W, Cout) parity planes: y[0, 2*ph+pw, a, b, c]
#                                  == conv_out[c, 2*(r*TH+a)+ph, 2*b+pw]
#   s_ref   : (1, 1, Cout)        per-block per-channel sum of conv outputs
#   ss_ref  : (1, 1, Cout)        per-block per-channel sum of squares
# ---------------------------------------------------------------------------
def _upconv_stats_kernel(xb_ref, xt0_ref, xt1_ref, wc_ref, y_ref, s_ref, ss_ref):
    TH = xb_ref.shape[1]
    W = xb_ref.shape[2] - 2
    Cin = xb_ref.shape[3]
    Cout = y_ref.shape[4]

    # (TH + 2, W + 2, Cin): all original-resolution rows this tile needs.
    xloc = jnp.concatenate([xb_ref[0], xt0_ref[0], xt1_ref[0]], axis=0)

    s_tot = jnp.zeros((1, Cout), jnp.float32)
    ss_tot = jnp.zeros((1, Cout), jnp.float32)
    for ph in range(2):           # output row parity
        for pw in range(2):       # output column parity
            acc = jnp.zeros((TH * W, Cout), jnp.float32)
            for dh in range(2):
                for dw in range(2):
                    tap = ((ph * 2 + pw) * 2 + dh) * 2 + dw
                    patch = xloc[ph + dh:ph + dh + TH,
                                 pw + dw:pw + dw + W, :].reshape(TH * W, Cin)
                    acc = acc + jnp.dot(patch, wc_ref[tap],
                                        preferred_element_type=jnp.float32)
            # NOTE: conv bias intentionally omitted; it cancels exactly under
            # batch-statistics BatchNorm.
            y_ref[0, ph * 2 + pw] = acc.reshape(TH, W, Cout).astype(y_ref.dtype)
            s_tot = s_tot + jnp.sum(acc, axis=0, keepdims=True)
            ss_tot = ss_tot + jnp.sum(acc * acc, axis=0, keepdims=True)
    s_ref[...] = s_tot[None]
    ss_ref[...] = ss_tot[None]


def upsample_conv_stats(x_nhwc, w, *, row_tile=None):
    """Fused nearest-upsample(2x) + 3x3 'same' conv (bias-free) + BN partial sums.

    Returns:
      y_planes : (N, 4, H, W, Cout) f32, parity-plane layout of the (2H, 2W) conv out
      psum     : (N*RT, 1, Cout)    per-block per-channel sums
      psumsq   : (N*RT, 1, Cout)    per-block per-channel sums of squares
    """
    N, H, W, Cin = x_nhwc.shape
    Cout = w.shape[-1]
    TH = row_tile or _choose_row_tile(H, W, Cin, Cout)
    assert H % TH == 0
    RT = H // TH

    # Tiny original-resolution halo pad; the 2x-upsampled activation is never
    # materialized in HBM.
    x_p = jnp.pad(x_nhwc, ((0, 0), (1, 1), (1, 1), (0, 0)))
    wc = _combined_weights(w)

    return pl.pallas_call(
        _upconv_stats_kernel,
        out_shape=(
            jax.ShapeDtypeStruct((N, 4, H, W, Cout), jnp.float32),
            jax.ShapeDtypeStruct((N * RT, 1, Cout), jnp.float32),
            jax.ShapeDtypeStruct((N * RT, 1, Cout), jnp.float32),
        ),
        grid=(N, RT),
        in_specs=[
            pl.BlockSpec((1, TH, W + 2, Cin), lambda n, r: (n, r, 0, 0)),
            pl.BlockSpec((1, 1, W + 2, Cin),
                         lambda n, r: (n, (r + 1) * TH, 0, 0)),
            pl.BlockSpec((1, 1, W + 2, Cin),
                         lambda n, r: (n, (r + 1) * TH + 1, 0, 0)),
            pl.BlockSpec((16, Cin, Cout), lambda n, r: (0, 0, 0)),
        ],
        out_specs=(
            pl.BlockSpec((1, 4, TH, W, Cout), lambda n, r: (n, 0, r, 0, 0)),
            pl.BlockSpec((1, 1, Cout), lambda n, r: (n * RT + r, 0, 0)),
            pl.BlockSpec((1, 1, Cout), lambda n, r: (n * RT + r, 0, 0)),
        ),
        compiler_params=pltpu.CompilerParams(
            dimension_semantics=("parallel", "parallel"),
            vmem_limit_bytes=32 * 1024 * 1024),
    )(x_p, x_p, x_p, wc)


# ---------------------------------------------------------------------------
# Kernel 2: fused per-channel affine (BatchNorm scale/shift) + ReLU epilogue on
# a lane-dense 2-D view (rows = N*4*H, lanes = W*C; scale/shift pre-tiled to W*C).
# ---------------------------------------------------------------------------
def _scale_shift_relu_kernel(y_ref, scale_ref, shift_ref, o_ref):
    o_ref[...] = jnp.maximum(
        y_ref[...] * scale_ref[...] + shift_ref[...], 0.0).astype(o_ref.dtype)


def bn_relu_apply(y_planes, scale, shift, *, row_block=None):
    N, P, H, W, C = y_planes.shape
    R = N * P * H
    L = W * C
    y2 = y_planes.reshape(R, L)                   # free row-major reshape
    scale_t = jnp.tile(scale, W).reshape(1, L)    # element b*C+c -> scale[c]
    shift_t = jnp.tile(shift, W).reshape(1, L)
    TR = row_block or _choose_ep_rows(R, L)
    assert R % TR == 0
    out2 = pl.pallas_call(
        _scale_shift_relu_kernel,
        out_shape=jax.ShapeDtypeStruct((R, L), jnp.float32),
        grid=(R // TR,),
        in_specs=[
            pl.BlockSpec((TR, L), lambda r: (r, 0)),
            pl.BlockSpec((1, L), lambda r: (0, 0)),
            pl.BlockSpec((1, L), lambda r: (0, 0)),
        ],
        out_specs=pl.BlockSpec((TR, L), lambda r: (r, 0)),
        compiler_params=pltpu.CompilerParams(
            dimension_semantics=("parallel",),
            vmem_limit_bytes=32 * 1024 * 1024),
    )(y2, scale_t, shift_t)
    return out2.reshape(N, P, H, W, C)


# ---------------------------------------------------------------------------
# up_conv forward: NCHW in -> NCHW out (N, Cout, 2H, 2W); matches the module.
# ---------------------------------------------------------------------------
def up_conv_forward(x_nchw, params, eps=1e-5):
    x = jnp.transpose(x_nchw, (0, 2, 3, 1)).astype(jnp.float32)    # -> NHWC
    y, psum, psumsq = upsample_conv_stats(x, params["w"])
    # params["b"] is deliberately unused: with training-mode BatchNorm (batch
    # statistics) a per-channel constant bias cancels exactly in (y - mean).

    N, P, H, W, Cout = y.shape
    count = N * P * H * W                         # == N * (2H) * (2W)
    total = jnp.sum(psum, axis=0)[0]              # (Cout,)
    total_sq = jnp.sum(psumsq, axis=0)[0]         # (Cout,)
    mean = total / count
    var = jnp.maximum(total_sq / count - mean * mean, 0.0)   # biased variance
    scale = params["gamma"] / jnp.sqrt(var + eps)
    shift = params["beta"] - mean * scale

    y = bn_relu_apply(y, scale, shift)            # (N, 4, H, W, Cout)

    # Un-interleave parity planes: out[n, c, 2a+ph, 2b+pw] = y[n, 2*ph+pw, a, b, c]
    y6 = y.reshape(N, 2, 2, H, W, Cout)
    out = jnp.transpose(y6, (0, 5, 3, 1, 4, 2)).reshape(N, Cout, 2 * H, 2 * W)
    return out


# ---------------------------------------------------------------------------
# Pure-JAX reference (sanity check of the Pallas kernels).
# ---------------------------------------------------------------------------
def _reference_forward(x_nchw, params, eps=1e-5):
    x_up = jnp.repeat(jnp.repeat(x_nchw, 2, axis=2), 2, axis=3)   # nearest 2x
    w_oihw = jnp.transpose(params["w"], (3, 2, 0, 1))
    y = lax.conv_general_dilated(
        x_up, w_oihw, window_strides=(1, 1), padding="SAME",
        dimension_numbers=("NCHW", "OIHW", "NCHW"))
    y = y + params["b"][None, :, None, None]
    m = jnp.mean(y, axis=(0, 2, 3), keepdims=True)
    v = jnp.mean((y - m) ** 2, axis=(0, 2, 3), keepdims=True)
    y = (y - m) / jnp.sqrt(v + eps) * params["gamma"][None, :, None, None] \
        + params["beta"][None, :, None, None]
    return jnp.maximum(y, 0.0)


if __name__ == "__main__":
    key = jax.random.PRNGKey(0)
    in_ch, out_ch = 4, 8
    N, H, W = 2, 16, 16

    k = jax.random.split(key, 5)
    x = jax.random.normal(k[0], (N, in_ch, H, W), jnp.float32)
    params = {
        "w": jax.random.normal(k[1], (3, 3, in_ch, out_ch), jnp.float32) * 0.1,
        "b": jax.random.normal(k[2], (out_ch,), jnp.float32) * 0.1,
        "gamma": 1.0 + 0.1 * jax.random.normal(k[3], (out_ch,), jnp.float32),
        "beta": 0.1 * jax.random.normal(k[4], (out_ch,), jnp.float32),
    }

    fwd = jax.jit(up_conv_forward)
    out = jax.block_until_ready(fwd(x, params))

    ref = _reference_forward(x, params)
    assert out.shape == (N, out_ch, 2 * H, 2 * W), out.shape
    err = float(jnp.max(jnp.abs(out - ref)))
    assert jnp.allclose(out, ref, atol=1e-3, rtol=1e-3), f"max abs err = {err}"

    print("KERNEL_OK")
</pallas_src>

<mosaic_0001>
module attributes {stable_mosaic.version = 11 : i64} {
  func.func @_upconv_stats_kernel(%arg0: i32, %arg1: i32, %arg2: memref<1x8x18x4xf32, #tpu.memory_space<vmem>>, %arg3: memref<1x1x18x4xf32, #tpu.memory_space<vmem>>, %arg4: memref<1x1x18x4xf32, #tpu.memory_space<vmem>>, %arg5: memref<16x4x8xf32, #tpu.memory_space<vmem>>, %arg6: memref<1x4x8x16x8xf32, #tpu.memory_space<vmem>>, %arg7: memref<1x1x8xf32, #tpu.memory_space<vmem>>, %arg8: memref<1x1x8xf32, #tpu.memory_space<vmem>>) attributes {dimension_semantics = [#tpu.dimension_semantics<parallel>, #tpu.dimension_semantics<parallel>], iteration_bounds = array<i64: 2, 2>, scalar_prefetch = 0 : i64, scratch_operands = 0 : i64, tpu.core_type = #tpu.core_type<tc>, window_params = [{transform_indices = @transform_0, window_bounds = array<i64: 1, 8, 18, 4>}, {transform_indices = @transform_1, window_bounds = array<i64: 1, 1, 18, 4>}, {transform_indices = @transform_2, window_bounds = array<i64: 1, 1, 18, 4>}, {pipeline_mode = #tpu.pipeline_mode<synchronous>, transform_indices = @transform_3, window_bounds = array<i64: 16, 4, 8>}, {transform_indices = @transform_4, window_bounds = array<i64: 1, 4, 8, 16, 8>}, {transform_indices = @transform_5, window_bounds = array<i64: 1, 1, 8>}, {transform_indices = @transform_6, window_bounds = array<i64: 1, 1, 8>}]} {
    %c0 = arith.constant 0 : index
    %c0_0 = arith.constant 0 : index
    %c0_1 = arith.constant 0 : index
    %c0_2 = arith.constant 0 : index
    %0 = vector.load %arg2[%c0, %c0_0, %c0_1, %c0_2] : memref<1x8x18x4xf32, #tpu.memory_space<vmem>>, vector<1x8x18x4xf32>
    %1 = vector.shape_cast %0 : vector<1x8x18x4xf32> to vector<8x18x4xf32>
    %c0_3 = arith.constant 0 : index
    %c0_4 = arith.constant 0 : index
    %c0_5 = arith.constant 0 : index
    %c0_6 = arith.constant 0 : index
    %2 = vector.load %arg3[%c0_3, %c0_4, %c0_5, %c0_6] : memref<1x1x18x4xf32, #tpu.memory_space<vmem>>, vector<1x1x18x4xf32>
    %3 = vector.shape_cast %2 : vector<1x1x18x4xf32> to vector<1x18x4xf32>
    %c0_7 = arith.constant 0 : index
    %c0_8 = arith.constant 0 : index
    %c0_9 = arith.constant 0 : index
    %c0_10 = arith.constant 0 : index
    %4 = vector.load %arg4[%c0_7, %c0_8, %c0_9, %c0_10] : memref<1x1x18x4xf32, #tpu.memory_space<vmem>>, vector<1x1x18x4xf32>
    %5 = vector.shape_cast %4 : vector<1x1x18x4xf32> to vector<1x18x4xf32>
    %6 = tpu.concatenate %1, %3, %5 in 0 : vector<8x18x4xf32>, vector<1x18x4xf32>, vector<1x18x4xf32> -> vector<10x18x4xf32>
    %cst = arith.constant 0.000000e+00 : f32
    %7 = vector.broadcast %cst : f32 to vector<1x8xf32>
    %cst_11 = arith.constant 0.000000e+00 : f32
    %8 = vector.broadcast %cst_11 : f32 to vector<1x8xf32>
    %cst_12 = arith.constant 0.000000e+00 : f32
    %9 = vector.broadcast %cst_12 : f32 to vector<128x8xf32>
    %10 = vector.extract_strided_slice %6 {offsets = [0, 0, 0], sizes = [8, 16, 4], strides = [1, 1, 1]} : vector<10x18x4xf32> to vector<8x16x4xf32>
    %11 = vector.shape_cast %10 : vector<8x16x4xf32> to vector<128x4xf32>
    %c0_13 = arith.constant 0 : index
    %c0_14 = arith.constant 0 : index
    %c0_15 = arith.constant 0 : index
    %12 = vector.load %arg5[%c0_13, %c0_14, %c0_15] : memref<16x4x8xf32, #tpu.memory_space<vmem>>, vector<1x4x8xf32>
    %13 = vector.shape_cast %12 : vector<1x4x8xf32> to vector<4x8xf32>
    %cst_16 = arith.constant dense<0.000000e+00> : vector<128x8xf32>
    %14 = tpu.matmul %11, %13, %cst_16 {dimension_numbers = #tpu.dot_dimension_numbers<[1], [0], [0], [1], [0, 0, 1, 1], [], []>} : vector<128x4xf32>, vector<4x8xf32>, vector<128x8xf32> -> vector<128x8xf32>
    %15 = arith.addf %9, %14 : vector<128x8xf32>
    %16 = vector.extract_strided_slice %6 {offsets = [0, 1, 0], sizes = [8, 16, 4], strides = [1, 1, 1]} : vector<10x18x4xf32> to vector<8x16x4xf32>
    %17 = vector.shape_cast %16 : vector<8x16x4xf32> to vector<128x4xf32>
    %c1 = arith.constant 1 : index
    %c0_17 = arith.constant 0 : index
    %c0_18 = arith.constant 0 : index
    %18 = vector.load %arg5[%c1, %c0_17, %c0_18] : memref<16x4x8xf32, #tpu.memory_space<vmem>>, vector<1x4x8xf32>
    %19 = vector.shape_cast %18 : vector<1x4x8xf32> to vector<4x8xf32>
    %cst_19 = arith.constant dense<0.000000e+00> : vector<128x8xf32>
    %20 = tpu.matmul %17, %19, %cst_19 {dimension_numbers = #tpu.dot_dimension_numbers<[1], [0], [0], [1], [0, 0, 1, 1], [], []>} : vector<128x4xf32>, vector<4x8xf32>, vector<128x8xf32> -> vector<128x8xf32>
    %21 = arith.addf %15, %20 : vector<128x8xf32>
    %22 = vector.extract_strided_slice %6 {offsets = [1, 0, 0], sizes = [8, 16, 4], strides = [1, 1, 1]} : vector<10x18x4xf32> to vector<8x16x4xf32>
    %23 = vector.shape_cast %22 : vector<8x16x4xf32> to vector<128x4xf32>
    %c2 = arith.constant 2 : index
    %c0_20 = arith.constant 0 : index
    %c0_21 = arith.constant 0 : index
    %24 = vector.load %arg5[%c2, %c0_20, %c0_21] : memref<16x4x8xf32, #tpu.memory_space<vmem>>, vector<1x4x8xf32>
    %25 = vector.shape_cast %24 : vector<1x4x8xf32> to vector<4x8xf32>
    %cst_22 = arith.constant dense<0.000000e+00> : vector<128x8xf32>
    %26 = tpu.matmul %23, %25, %cst_22 {dimension_numbers = #tpu.dot_dimension_numbers<[1], [0], [0], [1], [0, 0, 1, 1], [], []>} : vector<128x4xf32>, vector<4x8xf32>, vector<128x8xf32> -> vector<128x8xf32>
    %27 = arith.addf %21, %26 : vector<128x8xf32>
    %28 = vector.extract_strided_slice %6 {offsets = [1, 1, 0], sizes = [8, 16, 4], strides = [1, 1, 1]} : vector<10x18x4xf32> to vector<8x16x4xf32>
    %29 = vector.shape_cast %28 : vector<8x16x4xf32> to vector<128x4xf32>
    %c3 = arith.constant 3 : index
    %c0_23 = arith.constant 0 : index
    %c0_24 = arith.constant 0 : index
    %30 = vector.load %arg5[%c3, %c0_23, %c0_24] : memref<16x4x8xf32, #tpu.memory_space<vmem>>, vector<1x4x8xf32>
    %31 = vector.shape_cast %30 : vector<1x4x8xf32> to vector<4x8xf32>
    %cst_25 = arith.constant dense<0.000000e+00> : vector<128x8xf32>
    %32 = tpu.matmul %29, %31, %cst_25 {dimension_numbers = #tpu.dot_dimension_numbers<[1], [0], [0], [1], [0, 0, 1, 1], [], []>} : vector<128x4xf32>, vector<4x8xf32>, vector<128x8xf32> -> vector<128x8xf32>
    %33 = arith.addf %27, %32 : vector<128x8xf32>
    %34 = vector.shape_cast %33 : vector<128x8xf32> to vector<8x16x8xf32>
    %c0_26 = arith.constant 0 : index
    %c0_27 = arith.constant 0 : index
    %c0_28 = arith.constant 0 : index
    %c0_29 = arith.constant 0 : index
    %c0_30 = arith.constant 0 : index
    %35 = vector.load %arg6[%c0_26, %c0_27, %c0_28, %c0_29, %c0_30] : memref<1x4x8x16x8xf32, #tpu.memory_space<vmem>>, vector<1x1x8x16x8xf32>
    %36 = vector.shape_cast %35 : vector<1x1x8x16x8xf32> to vector<8x16x8xf32>
    %37 = vector.shape_cast %34 : vector<8x16x8xf32> to vector<1x1x8x16x8xf32>
    tpu.vector_store %arg6[%c0_26, %c0_27, %c0_28, %c0_29, %c0_30], %37 {strides = array<i32>} : memref<1x4x8x16x8xf32, #tpu.memory_space<vmem>>, vector<1x1x8x16x8xf32>,
    %cst_31 = arith.constant dense<0.000000e+00> : vector<8xf32>
    %38 = vector.multi_reduction <add>, %33, %cst_31 [0] : vector<128x8xf32> to vector<8xf32>
    %39 = vector.shape_cast %38 : vector<8xf32> to vector<1x8xf32>
    %40 = arith.addf %7, %39 : vector<1x8xf32>
    %41 = arith.mulf %33, %33 : vector<128x8xf32>
    %cst_32 = arith.constant dense<0.000000e+00> : vector<8xf32>
    %42 = vector.multi_reduction <add>, %41, %cst_32 [0] : vector<128x8xf32> to vector<8xf32>
    %43 = vector.shape_cast %42 : vector<8xf32> to vector<1x8xf32>
    %44 = arith.addf %8, %43 : vector<1x8xf32>
    %cst_33 = arith.constant 0.000000e+00 : f32
    %45 = vector.broadcast %cst_33 : f32 to vector<128x8xf32>
    %46 = vector.extract_strided_slice %6 {offsets = [0, 1, 0], sizes = [8, 16, 4], strides = [1, 1, 1]} : vector<10x18x4xf32> to vector<8x16x4xf32>
    %47 = vector.shape_cast %46 : vector<8x16x4xf32> to vector<128x4xf32>
    %c4 = arith.constant 4 : index
    %c0_34 = arith.constant 0 : index
    %c0_35 = arith.constant 0 : index
    %48 = vector.load %arg5[%c4, %c0_34, %c0_35] : memref<16x4x8xf32, #tpu.memory_space<vmem>>, vector<1x4x8xf32>
    %49 = vector.shape_cast %48 : vector<1x4x8xf32> to vector<4x8xf32>
    %cst_36 = arith.constant dense<0.000000e+00> : vector<128x8xf32>
    %50 = tpu.matmul %47, %49, %cst_36 {dimension_numbers = #tpu.dot_dimension_numbers<[1], [0], [0], [1], [0, 0, 1, 1], [], []>} : vector<128x4xf32>, vector<4x8xf32>, vector<128x8xf32> -> vector<128x8xf32>
    %51 = arith.addf %45, %50 : vector<128x8xf32>
    %52 = vector.extract_strided_slice %6 {offsets = [0, 2, 0], sizes = [8, 16, 4], strides = [1, 1, 1]} : vector<10x18x4xf32> to vector<8x16x4xf32>
    %53 = vector.shape_cast %52 : vector<8x16x4xf32> to vector<128x4xf32>
    %c5 = arith.constant 5 : index
    %c0_37 = arith.constant 0 : index
    %c0_38 = arith.constant 0 : index
    %54 = vector.load %arg5[%c5, %c0_37, %c0_38] : memref<16x4x8xf32, #tpu.memory_space<vmem>>, vector<1x4x8xf32>
    %55 = vector.shape_cast %54 : vector<1x4x8xf32> to vector<4x8xf32>
    %cst_39 = arith.constant dense<0.000000e+00> : vector<128x8xf32>
    %56 = tpu.matmul %53, %55, %cst_39 {dimension_numbers = #tpu.dot_dimension_numbers<[1], [0], [0], [1], [0, 0, 1, 1], [], []>} : vector<128x4xf32>, vector<4x8xf32>, vector<128x8xf32> -> vector<128x8xf32>
    %57 = arith.addf %51, %56 : vector<128x8xf32>
    %58 = vector.extract_strided_slice %6 {offsets = [1, 1, 0], sizes = [8, 16, 4], strides = [1, 1, 1]} : vector<10x18x4xf32> to vector<8x16x4xf32>
    %59 = vector.shape_cast %58 : vector<8x16x4xf32> to vector<128x4xf32>
    %c6 = arith.constant 6 : index
    %c0_40 = arith.constant 0 : index
    %c0_41 = arith.constant 0 : index
    %60 = vector.load %arg5[%c6, %c0_40, %c0_41] : memref<16x4x8xf32, #tpu.memory_space<vmem>>, vector<1x4x8xf32>
    %61 = vector.shape_cast %60 : vector<1x4x8xf32> to vector<4x8xf32>
    %cst_42 = arith.constant dense<0.000000e+00> : vector<128x8xf32>
    %62 = tpu.matmul %59, %61, %cst_42 {dimension_numbers = #tpu.dot_dimension_numbers<[1], [0], [0], [1], [0, 0, 1, 1], [], []>} : vector<128x4xf32>, vector<4x8xf32>, vector<128x8xf32> -> vector<128x8xf32>
    %63 = arith.addf %57, %62 : vector<128x8xf32>
    %64 = vector.extract_strided_slice %6 {offsets = [1, 2, 0], sizes = [8, 16, 4], strides = [1, 1, 1]} : vector<10x18x4xf32> to vector<8x16x4xf32>
    %65 = vector.shape_cast %64 : vector<8x16x4xf32> to vector<128x4xf32>
    %c7 = arith.constant 7 : index
    %c0_43 = arith.constant 0 : index
    %c0_44 = arith.constant 0 : index
    %66 = vector.load %arg5[%c7, %c0_43, %c0_44] : memref<16x4x8xf32, #tpu.memory_space<vmem>>, vector<1x4x8xf32>
    %67 = vector.shape_cast %66 : vector<1x4x8xf32> to vector<4x8xf32>
    %cst_45 = arith.constant dense<0.000000e+00> : vector<128x8xf32>
    %68 = tpu.matmul %65, %67, %cst_45 {dimension_numbers = #tpu.dot_dimension_numbers<[1], [0], [0], [1], [0, 0, 1, 1], [], []>} : vector<128x4xf32>, vector<4x8xf32>, vector<128x8xf32> -> vector<128x8xf32>
    %69 = arith.addf %63, %68 : vector<128x8xf32>
    %70 = vector.shape_cast %69 : vector<128x8xf32> to vector<8x16x8xf32>
    %c0_46 = arith.constant 0 : index
    %c1_47 = arith.constant 1 : index
    %c0_48 = arith.constant 0 : index
    %c0_49 = arith.constant 0 : index
    %c0_50 = arith.constant 0 : index
    %71 = vector.load %arg6[%c0_46, %c1_47, %c0_48, %c0_49, %c0_50] : memref<1x4x8x16x8xf32, #tpu.memory_space<vmem>>, vector<1x1x8x16x8xf32>
    %72 = vector.shape_cast %71 : vector<1x1x8x16x8xf32> to vector<8x16x8xf32>
    %73 = vector.shape_cast %70 : vector<8x16x8xf32> to vector<1x1x8x16x8xf32>
    tpu.vector_store %arg6[%c0_46, %c1_47, %c0_48, %c0_49, %c0_50], %73 {strides = array<i32>} : memref<1x4x8x16x8xf32, #tpu.memory_space<vmem>>, vector<1x1x8x16x8xf32>,
    %cst_51 = arith.constant dense<0.000000e+00> : vector<8xf32>
    %74 = vector.multi_reduction <add>, %69, %cst_51 [0] : vector<128x8xf32> to vector<8xf32>
    %75 = vector.shape_cast %74 : vector<8xf32> to vector<1x8xf32>
    %76 = arith.addf %40, %75 : vector<1x8xf32>
    %77 = arith.mulf %69, %69 : vector<128x8xf32>
    %cst_52 = arith.constant dense<0.000000e+00> : vector<8xf32>
    %78 = vector.multi_reduction <add>, %77, %cst_52 [0] : vector<128x8xf32> to vector<8xf32>
    %79 = vector.shape_cast %78 : vector<8xf32> to vector<1x8xf32>
    %80 = arith.addf %44, %79 : vector<1x8xf32>
    %cst_53 = arith.constant 0.000000e+00 : f32
    %81 = vector.broadcast %cst_53 : f32 to vector<128x8xf32>
    %82 = vector.extract_strided_slice %6 {offsets = [1, 0, 0], sizes = [8, 16, 4], strides = [1, 1, 1]} : vector<10x18x4xf32> to vector<8x16x4xf32>
    %83 = vector.shape_cast %82 : vector<8x16x4xf32> to vector<128x4xf32>
    %c8 = arith.constant 8 : index
    %c0_54 = arith.constant 0 : index
    %c0_55 = arith.constant 0 : index
    %84 = vector.load %arg5[%c8, %c0_54, %c0_55] : memref<16x4x8xf32, #tpu.memory_space<vmem>>, vector<1x4x8xf32>
    %85 = vector.shape_cast %84 : vector<1x4x8xf32> to vector<4x8xf32>
    %cst_56 = arith.constant dense<0.000000e+00> : vector<128x8xf32>
    %86 = tpu.matmul %83, %85, %cst_56 {dimension_numbers = #tpu.dot_dimension_numbers<[1], [0], [0], [1], [0, 0, 1, 1], [], []>} : vector<128x4xf32>, vector<4x8xf32>, vector<128x8xf32> -> vector<128x8xf32>
    %87 = arith.addf %81, %86 : vector<128x8xf32>
    %88 = vector.extract_strided_slice %6 {offsets = [1, 1, 0], sizes = [8, 16, 4], strides = [1, 1, 1]} : vector<10x18x4xf32> to vector<8x16x4xf32>
    %89 = vector.shape_cast %88 : vector<8x16x4xf32> to vector<128x4xf32>
    %c9 = arith.constant 9 : index
    %c0_57 = arith.constant 0 : index
    %c0_58 = arith.constant 0 : index
    %90 = vector.load %arg5[%c9, %c0_57, %c0_58] : memref<16x4x8xf32, #tpu.memory_space<vmem>>, vector<1x4x8xf32>
    %91 = vector.shape_cast %90 : vector<1x4x8xf32> to vector<4x8xf32>
    %cst_59 = arith.constant dense<0.000000e+00> : vector<128x8xf32>
    %92 = tpu.matmul %89, %91, %cst_59 {dimension_numbers = #tpu.dot_dimension_numbers<[1], [0], [0], [1], [0, 0, 1, 1], [], []>} : vector<128x4xf32>, vector<4x8xf32>, vector<128x8xf32> -> vector<128x8xf32>
    %93 = arith.addf %87, %92 : vector<128x8xf32>
    %94 = vector.extract_strided_slice %6 {offsets = [2, 0, 0], sizes = [8, 16, 4], strides = [1, 1, 1]} : vector<10x18x4xf32> to vector<8x16x4xf32>
    %95 = vector.shape_cast %94 : vector<8x16x4xf32> to vector<128x4xf32>
    %c10 = arith.constant 10 : index
    %c0_60 = arith.constant 0 : index
    %c0_61 = arith.constant 0 : index
    %96 = vector.load %arg5[%c10, %c0_60, %c0_61] : memref<16x4x8xf32, #tpu.memory_space<vmem>>, vector<1x4x8xf32>
    %97 = vector.shape_cast %96 : vector<1x4x8xf32> to vector<4x8xf32>
    %cst_62 = arith.constant dense<0.000000e+00> : vector<128x8xf32>
    %98 = tpu.matmul %95, %97, %cst_62 {dimension_numbers = #tpu.dot_dimension_numbers<[1], [0], [0], [1], [0, 0, 1, 1], [], []>} : vector<128x4xf32>, vector<4x8xf32>, vector<128x8xf32> -> vector<128x8xf32>
    %99 = arith.addf %93, %98 : vector<128x8xf32>
    %100 = vector.extract_strided_slice %6 {offsets = [2, 1, 0], sizes = [8, 16, 4], strides = [1, 1, 1]} : vector<10x18x4xf32> to vector<8x16x4xf32>
    %101 = vector.shape_cast %100 : vector<8x16x4xf32> to vector<128x4xf32>
    %c11 = arith.constant 11 : index
    %c0_63 = arith.constant 0 : index
    %c0_64 = arith.constant 0 : index
    %102 = vector.load %arg5[%c11, %c0_63, %c0_64] : memref<16x4x8xf32, #tpu.memory_space<vmem>>, vector<1x4x8xf32>
    %103 = vector.shape_cast %102 : vector<1x4x8xf32> to vector<4x8xf32>
    %cst_65 = arith.constant dense<0.000000e+00> : vector<128x8xf32>
    %104 = tpu.matmul %101, %103, %cst_65 {dimension_numbers = #tpu.dot_dimension_numbers<[1], [0], [0], [1], [0, 0, 1, 1], [], []>} : vector<128x4xf32>, vector<4x8xf32>, vector<128x8xf32> -> vector<128x8xf32>
    %105 = arith.addf %99, %104 : vector<128x8xf32>
    %106 = vector.shape_cast %105 : vector<128x8xf32> to vector<8x16x8xf32>
    %c0_66 = arith.constant 0 : index
    %c2_67 = arith.constant 2 : index
    %c0_68 = arith.constant 0 : index
    %c0_69 = arith.constant 0 : index
    %c0_70 = arith.constant 0 : index
    %107 = vector.load %arg6[%c0_66, %c2_67, %c0_68, %c0_69, %c0_70] : memref<1x4x8x16x8xf32, #tpu.memory_space<vmem>>, vector<1x1x8x16x8xf32>
    %108 = vector.shape_cast %107 : vector<1x1x8x16x8xf32> to vector<8x16x8xf32>
    %109 = vector.shape_cast %106 : vector<8x16x8xf32> to vector<1x1x8x16x8xf32>
    tpu.vector_store %arg6[%c0_66, %c2_67, %c0_68, %c0_69, %c0_70], %109 {strides = array<i32>} : memref<1x4x8x16x8xf32, #tpu.memory_space<vmem>>, vector<1x1x8x16x8xf32>,
    %cst_71 = arith.constant dense<0.000000e+00> : vector<8xf32>
    %110 = vector.multi_reduction <add>, %105, %cst_71 [0] : vector<128x8xf32> to vector<8xf32>
    %111 = vector.shape_cast %110 : vector<8xf32> to vector<1x8xf32>
    %112 = arith.addf %76, %111 : vector<1x8xf32>
    %113 = arith.mulf %105, %105 : vector<128x8xf32>
    %cst_72 = arith.constant dense<0.000000e+00> : vector<8xf32>
    %114 = vector.multi_reduction <add>, %113, %cst_72 [0] : vector<128x8xf32> to vector<8xf32>
    %115 = vector.shape_cast %114 : vector<8xf32> to vector<1x8xf32>
    %116 = arith.addf %80, %115 : vector<1x8xf32>
    %cst_73 = arith.constant 0.000000e+00 : f32
    %117 = vector.broadcast %cst_73 : f32 to vector<128x8xf32>
    %118 = vector.extract_strided_slice %6 {offsets = [1, 1, 0], sizes = [8, 16, 4], strides = [1, 1, 1]} : vector<10x18x4xf32> to vector<8x16x4xf32>
    %119 = vector.shape_cast %118 : vector<8x16x4xf32> to vector<128x4xf32>
    %c12 = arith.constant 12 : index
    %c0_74 = arith.constant 0 : index
    %c0_75 = arith.constant 0 : index
    %120 = vector.load %arg5[%c12, %c0_74, %c0_75] : memref<16x4x8xf32, #tpu.memory_space<vmem>>, vector<1x4x8xf32>
    %121 = vector.shape_cast %120 : vector<1x4x8xf32> to vector<4x8xf32>
    %cst_76 = arith.constant dense<0.000000e+00> : vector<128x8xf32>
    %122 = tpu.matmul %119, %121, %cst_76 {dimension_numbers = #tpu.dot_dimension_numbers<[1], [0], [0], [1], [0, 0, 1, 1], [], []>} : vector<128x4xf32>, vector<4x8xf32>, vector<128x8xf32> -> vector<128x8xf32>
    %123 = arith.addf %117, %122 : vector<128x8xf32>
    %124 = vector.extract_strided_slice %6 {offsets = [1, 2, 0], sizes = [8, 16, 4], strides = [1, 1, 1]} : vector<10x18x4xf32> to vector<8x16x4xf32>
    %125 = vector.shape_cast %124 : vector<8x16x4xf32> to vector<128x4xf32>
    %c13 = arith.constant 13 : index
    %c0_77 = arith.constant 0 : index
    %c0_78 = arith.constant 0 : index
    %126 = vector.load %arg5[%c13, %c0_77, %c0_78] : memref<16x4x8xf32, #tpu.memory_space<vmem>>, vector<1x4x8xf32>
    %127 = vector.shape_cast %126 : vector<1x4x8xf32> to vector<4x8xf32>
    %cst_79 = arith.constant dense<0.000000e+00> : vector<128x8xf32>
    %128 = tpu.matmul %125, %127, %cst_79 {dimension_numbers = #tpu.dot_dimension_numbers<[1], [0], [0], [1], [0, 0, 1, 1], [], []>} : vector<128x4xf32>, vector<4x8xf32>, vector<128x8xf32> -> vector<128x8xf32>
    %129 = arith.addf %123, %128 : vector<128x8xf32>
    %130 = vector.extract_strided_slice %6 {offsets = [2, 1, 0], sizes = [8, 16, 4], strides = [1, 1, 1]} : vector<10x18x4xf32> to vector<8x16x4xf32>
    %131 = vector.shape_cast %130 : vector<8x16x4xf32> to vector<128x4xf32>
    %c14 = arith.constant 14 : index
    %c0_80 = arith.constant 0 : index
    %c0_81 = arith.constant 0 : index
    %132 = vector.load %arg5[%c14, %c0_80, %c0_81] : memref<16x4x8xf32, #tpu.memory_space<vmem>>, vector<1x4x8xf32>
    %133 = vector.shape_cast %132 : vector<1x4x8xf32> to vector<4x8xf32>
    %cst_82 = arith.constant dense<0.000000e+00> : vector<128x8xf32>
    %134 = tpu.matmul %131, %133, %cst_82 {dimension_numbers = #tpu.dot_dimension_numbers<[1], [0], [0], [1], [0, 0, 1, 1], [], []>} : vector<128x4xf32>, vector<4x8xf32>, vector<128x8xf32> -> vector<128x8xf32>
    %135 = arith.addf %129, %134 : vector<128x8xf32>
    %136 = vector.extract_strided_slice %6 {offsets = [2, 2, 0], sizes = [8, 16, 4], strides = [1, 1, 1]} : vector<10x18x4xf32> to vector<8x16x4xf32>
    %137 = vector.shape_cast %136 : vector<8x16x4xf32> to vector<128x4xf32>
    %c15 = arith.constant 15 : index
    %c0_83 = arith.constant 0 : index
    %c0_84 = arith.constant 0 : index
    %138 = vector.load %arg5[%c15, %c0_83, %c0_84] : memref<16x4x8xf32, #tpu.memory_space<vmem>>, vector<1x4x8xf32>
    %139 = vector.shape_cast %138 : vector<1x4x8xf32> to vector<4x8xf32>
    %cst_85 = arith.constant dense<0.000000e+00> : vector<128x8xf32>
    %140 = tpu.matmul %137, %139, %cst_85 {dimension_numbers = #tpu.dot_dimension_numbers<[1], [0], [0], [1], [0, 0, 1, 1], [], []>} : vector<128x4xf32>, vector<4x8xf32>, vector<128x8xf32> -> vector<128x8xf32>
    %141 = arith.addf %135, %140 : vector<128x8xf32>
    %142 = vector.shape_cast %141 : vector<128x8xf32> to vector<8x16x8xf32>
    %c0_86 = arith.constant 0 : index
    %c3_87 = arith.constant 3 : index
    %c0_88 = arith.constant 0 : index
    %c0_89 = arith.constant 0 : index
    %c0_90 = arith.constant 0 : index
    %143 = vector.load %arg6[%c0_86, %c3_87, %c0_88, %c0_89, %c0_90] : memref<1x4x8x16x8xf32, #tpu.memory_space<vmem>>, vector<1x1x8x16x8xf32>
    %144 = vector.shape_cast %143 : vector<1x1x8x16x8xf32> to vector<8x16x8xf32>
    %145 = vector.shape_cast %142 : vector<8x16x8xf32> to vector<1x1x8x16x8xf32>
    tpu.vector_store %arg6[%c0_86, %c3_87, %c0_88, %c0_89, %c0_90], %145 {strides = array<i32>} : memref<1x4x8x16x8xf32, #tpu.memory_space<vmem>>, vector<1x1x8x16x8xf32>,
    %cst_91 = arith.constant dense<0.000000e+00> : vector<8xf32>
    %146 = vector.multi_reduction <add>, %141, %cst_91 [0] : vector<128x8xf32> to vector<8xf32>
    %147 = vector.shape_cast %146 : vector<8xf32> to vector<1x8xf32>
    %148 = arith.addf %112, %147 : vector<1x8xf32>
    %149 = arith.mulf %141, %141 : vector<128x8xf32>
    %cst_92 = arith.constant dense<0.000000e+00> : vector<8xf32>
    %150 = vector.multi_reduction <add>, %149, %cst_92 [0] : vector<128x8xf32> to vector<8xf32>
    %151 = vector.shape_cast %150 : vector<8xf32> to vector<1x8xf32>
    %152 = arith.addf %116, %151 : vector<1x8xf32>
    %153 = vector.shape_cast %148 : vector<1x8xf32> to vector<1x1x8xf32>
    %c0_93 = arith.constant 0 : index
    %c0_94 = arith.constant 0 : index
    %c0_95 = arith.constant 0 : index
    %154 = vector.load %arg7[%c0_93, %c0_94, %c0_95] : memref<1x1x8xf32, #tpu.memory_space<vmem>>, vector<1x1x8xf32>
    tpu.vector_store %arg7[%c0_93, %c0_94, %c0_95], %153 {strides = array<i32>} : memref<1x1x8xf32, #tpu.memory_space<vmem>>, vector<1x1x8xf32>,
    %155 = vector.shape_cast %152 : vector<1x8xf32> to vector<1x1x8xf32>
    %c0_96 = arith.constant 0 : index
    %c0_97 = arith.constant 0 : index
    %c0_98 = arith.constant 0 : index
    %156 = vector.load %arg8[%c0_96, %c0_97, %c0_98] : memref<1x1x8xf32, #tpu.memory_space<vmem>>, vector<1x1x8xf32>
    tpu.vector_store %arg8[%c0_96, %c0_97, %c0_98], %155 {strides = array<i32>} : memref<1x1x8xf32, #tpu.memory_space<vmem>>, vector<1x1x8xf32>,
    return
  }
  func.func @transform_0(%arg0: i32, %arg1: i32) -> (i32, i32, i32, i32) {
    %c0_i32 = arith.constant 0 : i32
    %c0_i32_0 = arith.constant 0 : i32
    %c0_i32_1 = arith.constant 0 : i32
    return %arg0, %arg1, %c0_i32, %c0_i32_0 : i32, i32, i32, i32
  }
  func.func @transform_1(%arg0: i32, %arg1: i32) -> (i32, i32, i32, i32) {
    %c1_i32 = arith.constant 1 : i32
    %0 = arith.addi %arg1, %c1_i32 : i32
    %c8_i32 = arith.constant 8 : i32
    %1 = arith.muli %0, %c8_i32 : i32
    %c0_i32 = arith.constant 0 : i32
    %c0_i32_0 = arith.constant 0 : i32
    %c0_i32_1 = arith.constant 0 : i32
    return %arg0, %1, %c0_i32, %c0_i32_0 : i32, i32, i32, i32
  }
  func.func @transform_2(%arg0: i32, %arg1: i32) -> (i32, i32, i32, i32) {
    %c1_i32 = arith.constant 1 : i32
    %0 = arith.addi %arg1, %c1_i32 : i32
    %c8_i32 = arith.constant 8 : i32
    %1 = arith.muli %0, %c8_i32 : i32
    %c1_i32_0 = arith.constant 1 : i32
    %2 = arith.addi %1, %c1_i32_0 : i32
    %c0_i32 = arith.constant 0 : i32
    %c0_i32_1 = arith.constant 0 : i32
    %c0_i32_2 = arith.constant 0 : i32
    return %arg0, %2, %c0_i32, %c0_i32_1 : i32, i32, i32, i32
  }
  func.func @transform_3(%arg0: i32, %arg1: i32) -> (i32, i32, i32) {
    %c0_i32 = arith.constant 0 : i32
    %c0_i32_0 = arith.constant 0 : i32
    %c0_i32_1 = arith.constant 0 : i32
    %c0_i32_2 = arith.constant 0 : i32
    return %c0_i32, %c0_i32_0, %c0_i32_1 : i32, i32, i32
  }
  func.func @transform_4(%arg0: i32, %arg1: i32) -> (i32, i32, i32, i32, i32) {
    %c0_i32 = arith.constant 0 : i32
    %c0_i32_0 = arith.constant 0 : i32
    %c0_i32_1 = arith.constant 0 : i32
    %c0_i32_2 = arith.constant 0 : i32
    return %arg0, %c0_i32, %arg1, %c0_i32_0, %c0_i32_1 : i32, i32, i32, i32, i32
  }
  func.func @transform_5(%arg0: i32, %arg1: i32) -> (i32, i32, i32) {
    %c2_i32 = arith.constant 2 : i32
    %0 = arith.muli %arg0, %c2_i32 : i32
    %1 = arith.addi %0, %arg1 : i32
    %c0_i32 = arith.constant 0 : i32
    %c0_i32_0 = arith.constant 0 : i32
    %c0_i32_1 = arith.constant 0 : i32
    return %1, %c0_i32, %c0_i32_0 : i32, i32, i32
  }
  func.func @transform_6(%arg0: i32, %arg1: i32) -> (i32, i32, i32) {
    %c2_i32 = arith.constant 2 : i32
    %0 = arith.muli %arg0, %c2_i32 : i32
    %1 = arith.addi %0, %arg1 : i32
    %c0_i32 = arith.constant 0 : i32
    %c0_i32_0 = arith.constant 0 : i32
    %c0_i32_1 = arith.constant 0 : i32
    return %1, %c0_i32, %c0_i32_0 : i32, i32, i32
  }
}

module attributes {stable_mosaic.version = 11 : i64} {
  func.func @_scale_shift_relu_kernel(%arg0: i32, %arg1: memref<64x128xf32, #tpu.memory_space<vmem>>, %arg2: memref<1x128xf32, #tpu.memory_space<vmem>>, %arg3: memref<1x128xf32, #tpu.memory_space<vmem>>, %arg4: memref<64x128xf32, #tpu.memory_space<vmem>>) attributes {dimension_semantics = [#tpu.dimension_semantics<parallel>], iteration_bounds = array<i64: 2>, scalar_prefetch = 0 : i64, scratch_operands = 0 : i64, tpu.core_type = #tpu.core_type<tc>, window_params = [{transform_indices = @transform_0, window_bounds = array<i64: 64, 128>}, {pipeline_mode = #tpu.pipeline_mode<synchronous>, transform_indices = @transform_1, window_bounds = array<i64: 1, 128>}, {pipeline_mode = #tpu.pipeline_mode<synchronous>, transform_indices = @transform_2, window_bounds = array<i64: 1, 128>}, {transform_indices = @transform_3, window_bounds = array<i64: 64, 128>}]} {
    %c0 = arith.constant 0 : index
    %c0_0 = arith.constant 0 : index
    %0 = vector.load %arg1[%c0, %c0_0] : memref<64x128xf32, #tpu.memory_space<vmem>>, vector<64x128xf32>
    %c0_1 = arith.constant 0 : index
    %c0_2 = arith.constant 0 : index
    %1 = vector.load %arg2[%c0_1, %c0_2] : memref<1x128xf32, #tpu.memory_space<vmem>>, vector<1x128xf32>
    %2 = vector.broadcast %1 : vector<1x128xf32> to vector<64x128xf32>
    %3 = arith.mulf %0, %2 : vector<64x128xf32>
    %c0_3 = arith.constant 0 : index
    %c0_4 = arith.constant 0 : index
    %4 = vector.load %arg3[%c0_3, %c0_4] : memref<1x128xf32, #tpu.memory_space<vmem>>, vector<1x128xf32>
    %5 = vector.broadcast %4 : vector<1x128xf32> to vector<64x128xf32>
    %6 = arith.addf %3, %5 : vector<64x128xf32>
    %cst = arith.constant 0.000000e+00 : f32
    %7 = vector.broadcast %cst : f32 to vector<64x128xf32>
    %8 = arith.maximumf %6, %7 : vector<64x128xf32>
    %c0_5 = arith.constant 0 : index
    %c0_6 = arith.constant 0 : index
    %9 = vector.load %arg4[%c0_5, %c0_6] : memref<64x128xf32, #tpu.memory_space<vmem>>, vector<64x128xf32>
    tpu.vector_store %arg4[%c0_5, %c0_6], %8 {strides = array<i32>} : memref<64x128xf32, #tpu.memory_space<vmem>>, vector<64x128xf32>,
    return
  }
  func.func @transform_0(%arg0: i32) -> (i32, i32) {
    %c0_i32 = arith.constant 0 : i32
    %c0_i32_0 = arith.constant 0 : i32
    return %arg0, %c0_i32 : i32, i32
  }
  func.func @transform_1(%arg0: i32) -> (i32, i32) {
    %c0_i32 = arith.constant 0 : i32
    %c0_i32_0 = arith.constant 0 : i32
    %c0_i32_1 = arith.constant 0 : i32
    return %c0_i32, %c0_i32_0 : i32, i32
  }
  func.func @transform_2(%arg0: i32) -> (i32, i32) {
    %c0_i32 = arith.constant 0 : i32
    %c0_i32_0 = arith.constant 0 : i32
    %c0_i32_1 = arith.constant 0 : i32
    return %c0_i32, %c0_i32_0 : i32, i32
  }
  func.func @transform_3(%arg0: i32) -> (i32, i32) {
    %c0_i32 = arith.constant 0 : i32
    %c0_i32_0 = arith.constant 0 : i32
    return %arg0, %c0_i32 : i32, i32
  }
}

</mosaic_0001>

<bundles_post_ra>
// kernel: tile.18
= control target key start
LH: loop header
LB: loop body
LE: loop exit
PB: predicated region body
PF: predicated region fallthrough
CT: control target
= control target key end

     0   :  { %s28_s0 = inlined_call_operand.vmem [shape: f32[8], index: 0, kind: input, shape index: {}]   ;;  %s29_s1 = inlined_call_operand.vmem [shape: f32[16,8], index: 1, kind: output, shape index: {}]  }
   0x1   :  { %v4_v0 = vld [vmem:[%s28_s0] ss:$0 sm:$0xff] }
   0x2   :  { %5 = vst [vmem:[%s29_s1] sm:$0xff] %v4_v0  ;;  %8 = vst [vmem:[%s29_s1 + $0x8] sm:$0xff] %v4_v0 }

// kernel: tile.19
= control target key start
LH: loop header
LB: loop body
LE: loop exit
PB: predicated region body
PF: predicated region fallthrough
CT: control target
= control target key end

     0   :  { %s131_s10 = smov 120   ;;  %s132_s11 = smov 104   ;;  %vm3_vm0 = vcmask 64512   ;;  %vm9_vm1 = vcmask 1048512   ;;  %vm15_vm2 = vcmask 982912   ;;  %vm21_vm3 = vcmask 917312   ;;  %s207_s0 = inlined_call_operand.vmem [shape: f32[16,8], index: 0, kind: input, shape index: {}]   ;;  %s208_s1 = inlined_call_operand.vmem [shape: f32[1,128], index: 1, kind: output, shape index: {}]  }
   0x1   :  { %v101_v0 = vld [vmem:[%s207_s0 + $0xf] sm:$0x1]   ;;  %v103_v1 = vld [vmem:[%s207_s0 + $0xd] sm:$0x1]   ;;  %v102_v2 = vld [vmem:[%s207_s0 + $0xe] sm:$0x1]  }
   0x2   :  { %7 = vrot.lane.b32.xlu0 %v101_v0, %s131_s10  ;;  %19 = vrot.lane.b32.xlu1 %v103_v1, %s132_s11  ;;  %v104_v3 = vld [vmem:[%s207_s0 + $0xc] sm:$0x1]   ;;  %s133_s16 = smov 112   ;;  %s134_s17 = smov 96   ;;  %v105_v4 = vld [vmem:[%s207_s0 + $0xb] sm:$0x1]  }
   0x3   :  { %v106_v5 = vld [vmem:[%s207_s0 + $0xa] sm:$0x1]   ;;  %v2_v6 = vld [vmem:[%s207_s0] sm:$0x1]   ;;  %s135_s24 = smov 88   ;;  %s136_s25 = smov 80  }
   0x4   :  { %4 = vst.msk [vmem:[#allocation0] sm:$0x1] %vm3_vm0, %v2_v6   ;;  %v107_v7 = vld [vmem:[%s207_s0 + $0x9] sm:$0x1]   ;;  %v108_v8 = vld [vmem:[%s207_s0 + $0x8] sm:$0x1]  }
   0x5   :  { %s137_s30 = smov 72   ;;  %s138_s2 = smov 64   ;;  %v109_v9 = vld [vmem:[%s207_s0 + $0x7] sm:$0x1]   ;;  %v110_v10 = vld [vmem:[%s207_s0 + $0x6] sm:$0x1]  }
   0x6   :  { %13 = vrot.lane.b32.xlu0 %v102_v2, %s133_s16  ;;  %25 = vrot.lane.b32.xlu1 %v104_v3, %s134_s17  ;;  %s139_s7 = smov 56   ;;  %s140_s8 = smov 48   ;;  %v111_v11 = vld [vmem:[%s207_s0 + $0x5] sm:$0x1]   ;;  %v112_v12 = vld [vmem:[%s207_s0 + $0x4] sm:$0x1]  }
   0x7   :  { %s141_s13 = smov 40   ;;  %s142_s14 = smov 32   ;;  %v113_v13 = vld [vmem:[%s207_s0 + $0x3] sm:$0x1]   ;;  %v114_v14 = vld [vmem:[%s207_s0 + $0x2] sm:$0x1]  }
   0x8   :  { %s143_s19 = smov 24   ;;  %s144_s20 = smov 16   ;;  %v115_v15 = vld [vmem:[%s207_s0 + $0x1] sm:$0x1]   ;;  %vm27_vm4 = vcmask 851712   ;;  %vm33_vm5 = vcmask 786112  }
   0x9   :  { %s145_s0 = smov 8   ;;  %vm39_vm6 = vcmask 720512   ;;  %vm45_vm7 = vcmask 654912   ;;  %vm51_vm8 = vcmask 589312   ;;  %vm57_vm9 = vcmask 523712  }
   0xa   :  { %31 = vrot.lane.b32.xlu0 %v105_v4, %s135_s24  ;;  %37 = vrot.lane.b32.xlu1 %v106_v5, %s136_s25  ;;  %vm63_vm10 = vcmask 458112   ;;  %vm69_vm11 = vcmask 392512   ;;  %vm75_vm12 = vcmask 326912   ;;  %vm81_vm13 = vcmask 261312  }
   0xb   :  { %vm87_vm14 = vcmask 195712   ;;  %vm93_vm15 = vcmask 130112  }
   0xe   :  { %43 = vrot.lane.b32.xlu0 %v107_v7, %s137_s30  ;;  %49 = vrot.lane.b32.xlu1 %v108_v8, %s138_s2 }
  0x12   :  { %55 = vrot.lane.b32.xlu0 %v109_v9, %s139_s7  ;;  %61 = vrot.lane.b32.xlu1 %v110_v10, %s140_s8 }
  0x16   :  { %67 = vrot.lane.b32.xlu0 %v111_v11, %s141_s13  ;;  %73 = vrot.lane.b32.xlu1 %v112_v12, %s142_s14 }
  0x1a   :  { %79 = vrot.lane.b32.xlu0 %v113_v13, %s143_s19  ;;  %85 = vrot.lane.b32.xlu1 %v114_v14, %s144_s20 }
  0x1e   :  { %91 = vrot.lane.b32.xlu0 %v115_v15, %s145_s0 }
  0x74   :  { %v8_v16 = vpop.permute.xlu0 %7   ;;  %v20_v17 = vpop.permute.xlu1 %19  }
  0x75   :  { %10 = vst.msk [vmem:[#allocation0] sm:$0x1] %vm9_vm1, %v8_v16  }
  0x78   :  { %v14_v18 = vpop.permute.xlu0 %13   ;;  %v26_v19 = vpop.permute.xlu1 %25  }
  0x79   :  { %16 = vst.msk [vmem:[#allocation0] sm:$0x1] %vm15_vm2, %v14_v18  }
  0x7a   :  { %22 = vst.msk [vmem:[#allocation0] sm:$0x1] %vm21_vm3, %v20_v17  }
  0x7b   :  { %28 = vst.msk [vmem:[#allocation0] sm:$0x1] %vm27_vm4, %v26_v19  }
  0x7c   :  { %v32_v20 = vpop.permute.xlu0 %31   ;;  %v38_v21 = vpop.permute.xlu1 %37  }
  0x7d   :  { %34 = vst.msk [vmem:[#allocation0] sm:$0x1] %vm33_vm5, %v32_v20  }
  0x7e   :  { %40 = vst.msk [vmem:[#allocation0] sm:$0x1] %vm39_vm6, %v38_v21  }
  0x80   :  { %v44_v22 = vpop.permute.xlu0 %43   ;;  %v50_v23 = vpop.permute.xlu1 %49  }
  0x81   :  { %46 = vst.msk [vmem:[#allocation0] sm:$0x1] %vm45_vm7, %v44_v22  }
  0x82   :  { %52 = vst.msk [vmem:[#allocation0] sm:$0x1] %vm51_vm8, %v50_v23  }
  0x84   :  { %v56_v24 = vpop.permute.xlu0 %55   ;;  %v62_v25 = vpop.permute.xlu1 %61  }
  0x85   :  { %58 = vst.msk [vmem:[#allocation0] sm:$0x1] %vm57_vm9, %v56_v24  }
  0x86   :  { %64 = vst.msk [vmem:[#allocation0] sm:$0x1] %vm63_vm10, %v62_v25  }
  0x88   :  { %v68_v26 = vpop.permute.xlu0 %67   ;;  %v74_v27 = vpop.permute.xlu1 %73  }
  0x89   :  { %70 = vst.msk [vmem:[#allocation0] sm:$0x1] %vm69_vm11, %v68_v26  }
  0x8a   :  { %76 = vst.msk [vmem:[#allocation0] sm:$0x1] %vm75_vm12, %v74_v27  }
  0x8c   :  { %v80_v28 = vpop.permute.xlu0 %79   ;;  %v86_v29 = vpop.permute.xlu1 %85  }
  0x8d   :  { %82 = vst.msk [vmem:[#allocation0] sm:$0x1] %vm81_vm13, %v80_v28  }
  0x8e   :  { %88 = vst.msk [vmem:[#allocation0] sm:$0x1] %vm87_vm14, %v86_v29  }
  0x90   :  { %v92_v30 = vpop.permute.xlu0 %91  }
  0x91   :  { %94 = vst.msk [vmem:[#allocation0] sm:$0x1] %vm93_vm15, %v92_v30  }
  0x98   :  { %v98_v31 = vld [vmem:[#allocation0] sm:$0x1] }
  0x99   :  { %100 = vst [vmem:[%s208_s1] sm:$0x1] %v98_v31 }

// kernel: up_conv_forward.3
= control target key start
LH: loop header
LB: loop body
LE: loop exit
PB: predicated region body
PF: predicated region fallthrough
CT: control target
= control target key end

     0   :  { %s333_s12 = smov 0   ;;  %s356_s0 = inlined_call_operand.vmem [shape: f32[128,128], index: 0, kind: input, shape index: {}]   ;;  %s357_s1 = inlined_call_operand.vmem [shape: f32[1,128], index: 1, kind: input, shape index: {}]   ;;  %s358_s2 = inlined_call_operand.vmem [shape: f32[1,128], index: 2, kind: input, shape index: {}]   ;;  %s359_s3 = inlined_call_operand.vmem [shape: f32[128,128], index: 3, kind: output, shape index: {}]  }
   0x1 LB: > { %s284_s13 = sadd.s32 4294967295, %s311_s12   ;;  %p288_p0 = scmp.ge.s32.totalorder %s311_s12, 1  ;;  %s311_s12 = sphi %s333_s12, %s13_s12  }
   0x2   : > { %p138_p1 = scmp.lt.s32.totalorder %s311_s12, 3 }
   0x4   : > { %p139_p2 = pnand %p288_p0, %p138_p1 }
   0x5   : > { %s289_s14 = sshll.u32 (!%p139_p2), %s284_s13, 3  ;;  %v293_v0 = vld [vmem:[%s357_s1] ss:$0 sm:$0xff] (!%p139_p2) }
   0x6   : > { %142 = sbr.rel (%p139_p2) target bundleno = 27 (0x1b), region = 32  ;;  %p163_p3 = scmp.lt.s32.totalorder (!%p139_p2), %s289_s14, 15  ;;  %v294_v1 = vld [vmem:[%s358_s2] ss:$0 sm:$0xff] (!%p139_p2) }
   0xd   : > { %s361_s14 = smov (!%p163_p3, %s289_s14), 15 }
   0xe   : > { %s290_s15 = sshll.u32 %s361_s14, 3 }
   0xf   : > { %s166_s20 = scalar_lea.vmem %s356_s0, %s290_s15  ;;  %s172_s25 = scalar_lea.vmem %s359_s3, %s290_s15 }
  0x10   : > { %v174_v2 = vld [vmem:[%s166_s20] sm:$0xff]  ;;  %v175_v3 = vld [vmem:[%s166_s20 + $0x8] sm:$0xff]  ;;  %v176_v4 = vld [vmem:[%s166_s20 + $0x10] sm:$0xff] }
  0x11   : > { %v189_v5 = vmul.f32 %v293_v0, %v174_v2  ;;  %v190_v6 = vmul.f32 %v293_v0, %v175_v3  ;;  %v191_v7 = vmul.f32 %v293_v0, %v176_v4  ;;  %v177_v8 = vld [vmem:[%s166_s20 + $0x18] sm:$0xff]  ;;  %v178_v9 = vld [vmem:[%s166_s20 + $0x20] sm:$0xff]  ;;  %v179_v10 = vld [vmem:[%s166_s20 + $0x28] sm:$0xff] }
  0x12   : > { %v192_v11 = vmul.f32 %v293_v0, %v177_v8  ;;  %v193_v12 = vmul.f32 %v293_v0, %v178_v9  ;;  %v194_v13 = vmul.f32 %v293_v0, %v179_v10  ;;  %v180_v14 = vld [vmem:[%s166_s20 + $0x30] sm:$0xff]  ;;  %v181_v15 = vld [vmem:[%s166_s20 + $0x38] sm:$0xff] }
  0x13   : > { %v204_v16 = vadd.f32 %v294_v1, %v189_v5  ;;  %v205_v17 = vadd.f32 %v294_v1, %v190_v6  ;;  %v206_v18 = vadd.f32 %v294_v1, %v191_v7  ;;  %v195_v19 = vmul.f32 %v293_v0, %v180_v14 }
  0x14   : > { %v207_v20 = vadd.f32 %v294_v1, %v192_v11  ;;  %v208_v21 = vadd.f32 %v294_v1, %v193_v12  ;;  %v209_v22 = vadd.f32 %v294_v1, %v194_v13  ;;  %v196_v23 = vmul.f32 %v293_v0, %v181_v15 }
  0x15   : > { %v212_v24 = vmax.f32 %v204_v16, 0.0  ;;  %v213_v25 = vmax.f32 %v205_v17, 0.0  ;;  %v214_v26 = vmax.f32 %v206_v18, 0.0  ;;  %v210_v27 = vadd.f32 %v294_v1, %v195_v19 }
  0x16   : > { %v215_v28 = vmax.f32 %v207_v20, 0.0  ;;  %v216_v29 = vmax.f32 %v208_v21, 0.0  ;;  %v217_v30 = vmax.f32 %v209_v22, 0.0  ;;  %v211_v31 = vadd.f32 %v294_v1, %v196_v23 }
  0x17   : > { %220 = vst [vmem:[%s172_s25] sm:$0xff] %v212_v24  ;;  %221 = vst [vmem:[%s172_s25 + $0x8] sm:$0xff] %v213_v25  ;;  %v218_v32 = vmax.f32 %v210_v27, 0.0 }
  0x18   : > { %222 = vst [vmem:[%s172_s25 + $0x10] sm:$0xff] %v214_v26  ;;  %223 = vst [vmem:[%s172_s25 + $0x18] sm:$0xff] %v215_v28  ;;  %v219_v33 = vmax.f32 %v211_v31, 0.0 }
  0x19   : > { %224 = vst [vmem:[%s172_s25 + $0x20] sm:$0xff] %v216_v29  ;;  %225 = vst [vmem:[%s172_s25 + $0x28] sm:$0xff] %v217_v30 }
  0x1a   : > { %226 = vst [vmem:[%s172_s25 + $0x30] sm:$0xff] %v218_v32  ;;  %227 = vst [vmem:[%s172_s25 + $0x38] sm:$0xff] %v219_v33 }
  0x1b PF: > { %s13_s12 = sadd.s32 1, %s311_s12  }
  0x1c   : > { %p10_p4 = scmp.ge.s32.totalorder %s13_s12, 4  }
  0x1e   :  { %12 = sbr.rel (!%p10_p4) target bundleno = 1 (0x1), region = 62 }

// kernel: up_conv_forward.2
= control target key start
LH: loop header
LB: loop body
LE: loop exit
PB: predicated region body
PF: predicated region fallthrough
CT: control target
= control target key end

     0   :  { %s5578_s21 = smov 0   ;;  %s5580_s22 = smov 0   ;;  %s6891_s0 = inlined_call_operand.vmem [shape: f32[2,18,18,4], index: 0, kind: input, shape index: {}, may-alias: {0,1,2}]   ;;  %s6892_s1 = inlined_call_operand.vmem [shape: f32[2,18,18,4], index: 1, kind: input, shape index: {}, may-alias: {0,1,2}]   ;;  %s6893_s2 = inlined_call_operand.vmem [shape: f32[2,18,18,4], index: 2, kind: input, shape index: {}, may-alias: {0,1,2}]   ;;  %s6894_s3 = inlined_call_operand.vmem [shape: f32[16,4,8], index: 3, kind: input, shape index: {}]   ;;  %s6895_s4 = inlined_call_operand.vmem [shape: f32[2,4,16,16,8], index: 4, kind: output, shape index: {0}]   ;;  %s6896_s5 = inlined_call_operand.vmem [shape: f32[4,1,8], index: 5, kind: output, shape index: {1}]   ;;  %s6897_s6 = inlined_call_operand.vmem [shape: f32[4,1,8], index: 6, kind: output, shape index: {2}]  }
   0x1   :  { %s5582_s23 = smov 0   ;;  %s5584_s24 = smov 0  }
   0x2   :  { %s5586_s25 = smov 0   ;;  %s5588_s26 = smov 0  }
   0x3   :  { %s5590_s27 = smov 0  }
   0x4 LB: > { %s26_s28 = sadd.s32 1, %s5533_s25  ;;  %s29_s29 = sadd.s32 1, %s5537_s26  ;;  %s5541_s27 = sphi %s5590_s27, %s17_s27   ;;  %s5537_s26 = sphi %s5588_s26, %s6904_s26   ;;  %s5533_s25 = sphi %s5586_s25, %s6903_s25   ;;  %s5529_s24 = sphi %s5584_s24, %s6902_s24   ;;  %s5525_s23 = sphi %s5582_s23, %s6901_s23   ;;  %s5521_s22 = sphi %s5580_s22, %s6900_s22   ;;  %s5517_s21 = sphi %s5578_s21, %s6899_s21  }
   0x5   : > { %p27_p0 = scmp.ge.s32.totalorder %s26_s28, 2  ;;  %s4170_s30 = sadd.s32 4294967295, %s5541_s27  }
   0x6   : > { %p163_p1 = scmp.ne.s32.totalorder %s5521_s22, %s5517_s21  ;;  %p164_p2 = scmp.eq.s32.totalorder %s4170_s30, 3 }
   0x7   : > { %s6906_s28 = smov (%p27_p0, %s26_s28), 0  ;;  %s6908_s29 = smov (!%p27_p0, %s29_s29), %s5537_s26 }
   0x8   : > { %s149_s7 = ssub.s32 %s5533_s25, %s6906_s28  ;;  %p31_p3 = scmp.ge.s32.totalorder %s6908_s29, 2 }
   0x9   : > { %p4182_p4 = scmp.ge.s32.totalorder %s5541_s27, 1  ;;  %p5624_p5 = por %p164_p2, %p163_p1 }
   0xa   : > { %p309_p6 = scmp.lt.s32.totalorder %s5541_s27, 5  ;;  %s6910_s29 = smov (%p31_p3, %s6908_s29), 0 }
   0xb   : > { %s148_s9 = ssub.s32 %s5537_s26, %s6910_s29  ;;  %s153_s11 = sadd.s32 1, %s5521_s22 }
   0xc   : > { %p310_p7 = pnand %p4182_p4, %p309_p6  ;;  %s150_s10 = sor.u32 %s149_s7, %s148_s9 }
   0xd   : > { %p151_p8 = scmp.eq.s32.totalorder %s150_s10, 0  ;;  %v4192_v0 = vld [vmem:[%s6894_s3 + $0x4] sm:$0xf] (!%p310_p7)  ;;  %vm576_vm0 = vcmask (!%p310_p7), 1043456   ;;  %v4264_v1 = vld [vmem:[%s6894_s3 + $0x14] sm:$0xf] (!%p310_p7) }
   0xe   : > { %313 = sbr.rel (%p310_p7) target bundleno = 538 (0x21a), region = 36  ;;  %s5644_s17 = sshll.u32 (!%p310_p7), %s5525_s23, 3  ;;  %4819 = vmatprep.subr.msk.mxu0 (!%p310_p7), %vm576_vm0, %v4192_v0  ;;  %4923 = vmatprep.subr.msk.mxu1 (!%p310_p7), %vm576_vm0, %v4264_v1  ;;  %v475_v2 = vld [vmem:[%s6894_s3] sm:$0xf] (!%p310_p7)  ;;  %v4263_v3 = vld [vmem:[%s6894_s3 + $0x10] sm:$0xf] (!%p310_p7) }
   0xf   : > { %s5635_s12 = scalar_select %p151_p8, %s5521_s22, %s153_s11  }
  0x10   : > { %p387_p9 = scmp.lt.s32.totalorder (!%p310_p7), %s5529_s24, 1  ;;  %p389_p10 = scmp.lt.s32.totalorder (!%p310_p7), %s5644_s17, 17  ;;  %4820 = vmatpush3.msk.msra.mxu0 (!%p310_p7), %vm576_vm0, %v4192_v0  ;;  %4924 = vmatpush3.msk.msra.mxu1 (!%p310_p7), %vm576_vm0, %v4264_v1  ;;  %vm500_vm1 = vcmask (!%p310_p7), 1046528   ;;  %vm543_vm2 = vcmask (!%p310_p7), 31744   ;;  %vm1364_vm3 = vcmask (!%p310_p7), 1045504   ;;  %vm1253_vm4 = vcmask (!%p310_p7), 64512  }
  0x11   : > { %4845 = vmatprep.subr.msk.mxu0 (!%p310_p7), %vm576_vm0, %v475_v2  ;;  %4949 = vmatprep.subr.msk.mxu1 (!%p310_p7), %vm576_vm0, %v4263_v3  ;;  %v5719_v30 = vld [vmem:[%s6894_s3 + $0x8] sm:$0xf] (!%p310_p7)  ;;  %v5735_v36 = vld [vmem:[%s6894_s3 + $0x18] sm:$0xf] (!%p310_p7)  ;;  %s5993_s15 = sadd.s32 (!%p310_p7), 8, %s5644_s17  ;;  %vm3692_vm5 = vcmask (!%p310_p7), 57344  }
  0x12   : > { %p406_p11 = scmp.lt.s32.totalorder (!%p310_p7), %s5993_s15, 17  ;;  %s417_s16 = sadd.s32 (!%p310_p7), 1, %s5993_s15 }
  0x13   : > { %p420_p12 = scmp.lt.s32.totalorder (!%p310_p7), %s417_s16, 17 }
  0x15   : > { %s388_s7 = scalar_select %p387_p9, %s5529_s24, 1 }
  0x16   : > { %s390_s9 = scalar_select %p389_p10, %s5644_s17, 17 }
  0x17   : > { %s5662_s10 = smul.u32 54, %s388_s7  ;;  %s6912_s16 = smov (!%p420_p12, %s417_s16), 17 }
  0x18   : > { %s5427_s11 = smul.u32 3, %s390_s9  ;;  %s4530_s20 = sshll.u32 (%p5624_p5), %s5529_s24, 7 }
  0x19   : > { %s407_s17 = scalar_select %p406_p11, %s5993_s15, 17 }
  0x1a   : > { %s393_s13 = sadd.s32 %s5662_s10, %s5427_s11  ;;  %s5430_s15 = smul.u32 3, %s6912_s16 }
  0x1b   : > { %s4185_s14 = sshll.u32 %s393_s13, 3  ;;  %s5429_s30 = smul.u32 3, %s407_s17 }
  0x1c   : > { %s5668_s18 = scalar_lea.vmem %s6891_s0, %s4185_s14 }
  0x1d   : > { %v5671_v4 = vld [vmem:[%s5668_s18] sm:$0xff]  ;;  %v5674_v5 = vld [vmem:[%s5668_s18 + $0x8] sm:$0xff]  ;;  %v447_v6 = vld [vmem:[%s5668_s18 + $0x10] sm:$0x3]  ;;  %s410_s7 = sadd.s32 %s5429_s30, %s5662_s10 }
  0x1e   : > { %v501_v7 = vrot.slane %v5671_v4, 1  ;;  %v502_v8 = vrot.slane %v5674_v5, 1  ;;  %v1365_v9 = vrot.slane %v5671_v4, 2  ;;  %v1366_v10 = vrot.slane %v5674_v5, 2  ;;  %v5682_v11 = vld [vmem:[%s5668_s18 + $0x18] sm:$0xff]  ;;  %v5685_v12 = vld [vmem:[%s5668_s18 + $0x20] sm:$0xff] }
  0x1f   : > { %v504_v13 = vrot.slane %v447_v6, 1  ;;  %v1368_v14 = vrot.slane %v447_v6, 2  ;;  %v506_v15 = vrot.slane %v5682_v11, 1  ;;  %v507_v16 = vrot.slane %v5685_v12, 1  ;;  %v450_v17 = vld [vmem:[%s5668_s18 + $0x28] sm:$0x3] }
  0x20   : > { %v5691_v18 = vsel %vm500_vm1, %v501_v7, %v502_v8  ;;  %v1367_v19 = vsel %vm1364_vm3, %v1365_v9, %v1366_v10  ;;  %v1370_v20 = vrot.slane %v5682_v11, 2  ;;  %v1371_v21 = vrot.slane %v5685_v12, 2  ;;  %v5697_v22 = vld [vmem:[%s5668_s18 + $0x30] sm:$0xff]  ;;  %v5700_v23 = vld [vmem:[%s5668_s18 + $0x38] sm:$0xff]  ;;  %v453_v24 = vld [vmem:[%s5668_s18 + $0x40] sm:$0x3] }
  0x21   : > { %4821 = vmatprep.mubr.msk.f32.mxu0 %vm543_vm2, %v5691_v18  ;;  %4925 = vmatprep.mubr.msk.f32.mxu1 %vm543_vm2, %v1367_v19  ;;  %v5707_v25 = vsel %vm500_vm1, %v502_v8, %v504_v13  ;;  %v1369_v26 = vsel %vm1364_vm3, %v1366_v10, %v1368_v14  ;;  %v5711_v27 = vsel %vm500_vm1, %v506_v15, %v507_v16  ;;  %v509_v28 = vrot.slane %v450_v17, 1  ;;  %v5714_v29 = vld [vmem:[%s5668_s18 + $0x48] sm:$0xff]  ;;  %v5730_v35 = vld [vmem:[%s5668_s18 + $0x50] sm:$0xff]  ;;  %v456_v41 = vld [vmem:[%s5668_s18 + $0x58] sm:$0x3]  ;;  %s4187_s9 = sshll.u32 %s410_s7, 3 }
  0x22   : > { %4822 = vmatmul.mubr.msk.f32.vlgmr.msra.gmra.mrb[0].mxu0 %vm543_vm2, %v5707_v25  ;;  %4926 = vmatmul.mubr.msk.f32.vlgmr.msra.gmra.mrb[0].mxu1 %vm543_vm2, %v1369_v26  ;;  %v5725_v31 = vsel %vm1364_vm3, %v1370_v20, %v1371_v21  ;;  %v1373_v32 = vrot.slane %v450_v17, 2  ;;  %v511_v33 = vrot.slane %v5697_v22, 1  ;;  %v512_v34 = vrot.slane %v5700_v23, 1  ;;  %v5757_v46 = vld [vmem:[%s5668_s18 + $0x60] sm:$0xff]  ;;  %v5760_v47 = vld [vmem:[%s5668_s18 + $0x68] sm:$0xff]  ;;  %v5798_v63 = vld [vmem:[%s5668_s18 + $0x78] sm:$0xff]  ;;  %s412_s14 = scalar_lea.vmem %s6892_s1, %s4187_s9 }
  0x23   : > { %4846 = vmatpush3.msk.msra.mxu0 %vm576_vm0, %v475_v2  ;;  %4950 = vmatpush3.msk.msra.mxu1 %vm576_vm0, %v4263_v3  ;;  %v5740_v37 = vsel %vm500_vm1, %v507_v16, %v509_v28  ;;  %v1375_v38 = vrot.slane %v5697_v22, 2  ;;  %v1376_v39 = vrot.slane %v5700_v23, 2  ;;  %v514_v40 = vrot.slane %v453_v24, 1  ;;  %v459_v62 = vld [vmem:[%s5668_s18 + $0x70] sm:$0x3]  ;;  %v5801_v0 = vld [vmem:[%s5668_s18 + $0x80] sm:$0xff] }
  0x24   : > { %4824 = vmatprep.mubr.msk.f32.mxu0 %vm543_vm2, %v5711_v27  ;;  %4928 = vmatprep.mubr.msk.f32.mxu1 %vm543_vm2, %v5725_v31  ;;  %v5750_v42 = vsel %vm1364_vm3, %v1371_v21, %v1373_v32  ;;  %v5753_v43 = vsel %vm500_vm1, %v511_v33, %v512_v34  ;;  %v1378_v44 = vrot.slane %v453_v24, 2  ;;  %v516_v45 = vrot.slane %v5714_v29, 1  ;;  %v462_v9 = vld [vmem:[%s5668_s18 + $0x88] sm:$0x3]  ;;  %v5829_v16 = vld [vmem:[%s5668_s18 + $0x90] sm:$0xff]  ;;  %v5832_v17 = vld [vmem:[%s5668_s18 + $0x98] sm:$0xff] }
  0x25   : > { %v5763_v48 = vsel %vm1364_vm3, %v1375_v38, %v1376_v39  ;;  %v517_v49 = vrot.slane %v5730_v35, 1  ;;  %v1380_v50 = vrot.slane %v5714_v29, 2  ;;  %4871 = vmatprep.subr.msk.mxu0 %vm576_vm0, %v5719_v30  ;;  %4975 = vmatprep.subr.msk.mxu1 %vm576_vm0, %v5735_v36  ;;  %v1381_v51 = vrot.slane %v5730_v35, 2  ;;  %s364_s7 = sand.u32 1, %s5517_s21   ;;  %s4190_s21 = sshll.u32 %s5529_s24, 1 }
  0x26   : > { %4825 = vmatmul.mubr.msk.f32.gmra.mrb[2].mxu0 %vm543_vm2, %v5740_v37  ;;  %4929 = vmatmul.mubr.msk.f32.gmra.mrb[2].mxu1 %vm543_vm2, %v5750_v42  ;;  %v519_v52 = vrot.slane %v456_v41, 1  ;;  %v1383_v53 = vrot.slane %v456_v41, 2  ;;  %v5781_v54 = vsel %vm500_vm1, %v512_v34, %v514_v40  ;;  %v5784_v55 = vsel %vm1364_vm3, %v1376_v39, %v1378_v44  ;;  %v465_v39 = vld [vmem:[%s5668_s18 + $0xa0] sm:$0x3]  ;;  %v5860_v40 = vld [vmem:[%s5668_s18 + $0xa8] sm:$0xff]  ;;  %v5863_v41 = vld [vmem:[%s5668_s18 + $0xb0] sm:$0xff]  ;;  %s432_s13 = sadd.s32 %s5525_s23, %s4190_s21 }
  0x27   : > { %4827 = vmatprep.mubr.msk.f32.mxu0 %vm543_vm2, %v5753_v43  ;;  %4931 = vmatprep.mubr.msk.f32.mxu1 %vm543_vm2, %v5763_v48  ;;  %v521_v56 = vrot.slane %v5757_v46, 1  ;;  %v522_v57 = vrot.slane %v5760_v47, 1  ;;  %v5789_v58 = vsel %vm500_vm1, %v516_v45, %v517_v49  ;;  %v5792_v59 = vsel %vm1364_vm3, %v1380_v50, %v1381_v51  ;;  %s4183_s9 = sshll.u32 %s364_s7, 9  ;;  %p433_p13 = scmp.lt.s32.totalorder %s432_s13, 3 }
  0x28   : > { %v1385_v60 = vrot.slane %v5757_v46, 2  ;;  %v1386_v61 = vrot.slane %v5760_v47, 2  ;;  %v5808_v1 = vsel %vm500_vm1, %v517_v49, %v519_v52  ;;  %v5811_v2 = vsel %vm1364_vm3, %v1381_v51, %v1383_v53  ;;  %s6461_s11 = scalar_lea.vmem [#allocation2], %s4183_s9 }
  0x29   : > { %v5818_v3 = vsel %vm500_vm1, %v521_v56, %v522_v57  ;;  %v524_v6 = vrot.slane %v459_v62, 1  ;;  %v1388_v7 = vrot.slane %v459_v62, 2  ;;  %v526_v8 = vrot.slane %v5798_v63, 1  ;;  %s6914_s13 = smov (!%p433_p13, %s432_s13), 3 }
  0x2a   : > { %4828 = vmatmul.mubr.msk.f32.gmra.mrb[4].mxu0 %vm543_vm2, %v5781_v54  ;;  %4932 = vmatmul.mubr.msk.f32.gmra.mrb[4].mxu1 %vm543_vm2, %v5784_v55  ;;  %v5823_v10 = vsel %vm1364_vm3, %v1385_v60, %v1386_v61  ;;  %v527_v13 = vrot.slane %v5801_v0, 1  ;;  %v1390_v14 = vrot.slane %v5798_v63, 2  ;;  %v1391_v15 = vrot.slane %v5801_v0, 2  ;;  %s435_s16 = scalar_lea.vmem %s6896_s5, %s6914_s13 }
  0x2b   : > { %4830 = vmatprep.mubr.msk.f32.mxu0 %vm543_vm2, %v5789_v58  ;;  %4934 = vmatprep.mubr.msk.f32.mxu1 %vm543_vm2, %v5792_v59  ;;  %v529_v19 = vrot.slane %v462_v9, 1  ;;  %v1393_v20 = vrot.slane %v462_v9, 2  ;;  %v5843_v21 = vsel %vm500_vm1, %v522_v57, %v524_v6  ;;  %v5846_v24 = vsel %vm1364_vm3, %v1386_v61, %v1388_v7  ;;  %v468_v61 = vld [vmem:[%s5668_s18 + $0xb8] sm:$0x3]  ;;  %s424_s18 = sadd.s32 %s5430_s15, %s5662_s10  ;;  %s4546_s10 = sshll.u32 (%p5624_p5), %s5525_s23, 4 }
  0x2c   : > { %v531_v26 = vrot.slane %v5829_v16, 1  ;;  %v532_v28 = vrot.slane %v5832_v17, 1  ;;  %v5851_v32 = vsel %vm500_vm1, %v526_v8, %v527_v13  ;;  %v5854_v33 = vsel %vm1364_vm3, %v1390_v14, %v1391_v15  ;;  %s4189_s19 = sshll.u32 %s424_s18, 3  ;;  %s3715_s8 = sadd.s32 (%p5624_p5), %s4546_s10, %s4530_s20 }
  0x2d   : > { %v1395_v34 = vrot.slane %v5829_v16, 2  ;;  %v1396_v38 = vrot.slane %v5832_v17, 2  ;;  %v5870_v44 = vsel %vm500_vm1, %v527_v13, %v529_v19  ;;  %v5873_v45 = vsel %vm1364_vm3, %v1391_v15, %v1393_v20  ;;  %v4245_v19 = vld [vmem:[%s6894_s3 + $0xc] sm:$0xf]  ;;  %v4317_v20 = vld [vmem:[%s6894_s3 + $0x1c] sm:$0xf]  ;;  %s426_s30 = scalar_lea.vmem %s6893_s2, %s4189_s19  ;;  %s442_s19 = scalar_lea.vmem %s6897_s6, %s6914_s13 }
  0x2e   : > { %4831 = vmatmul.mubr.msk.f32.gmra.mrb[6].mxu0 %vm543_vm2, %v5808_v1  ;;  %4935 = vmatmul.mubr.msk.f32.gmra.mrb[6].mxu1 %vm543_vm2, %v5811_v2  ;;  %v5880_v49 = vsel %vm500_vm1, %v531_v26, %v532_v28  ;;  %v534_v50 = vrot.slane %v465_v39, 1  ;;  %v1398_v51 = vrot.slane %v465_v39, 2  ;;  %v536_v52 = vrot.slane %v5860_v40, 1  ;;  %v4351_v39 = vld [vmem:[%s6894_s3 + $0x20] sm:$0xf] }
  0x2f   : > { %4833 = vmatprep.mubr.msk.f32.mxu0 %vm543_vm2, %v5818_v3  ;;  %4937 = vmatprep.mubr.msk.f32.mxu1 %vm543_vm2, %v5823_v10  ;;  %v5884_v53 = vsel %vm1364_vm3, %v1395_v34, %v1396_v38  ;;  %v537_v56 = vrot.slane %v5863_v41, 1  ;;  %v1400_v57 = vrot.slane %v5860_v40, 2  ;;  %v1401_v60 = vrot.slane %v5863_v41, 2 }
  0x30   : > { %v5899_v62 = vsel %vm500_vm1, %v532_v28, %v534_v50  ;;  %v5902_v6 = vsel %vm1364_vm3, %v1396_v38, %v1398_v51  ;;  %v539_v7 = vrot.slane %v468_v61, 1  ;;  %v1403_v8 = vrot.slane %v468_v61, 2  ;;  %v4439_v50 = vld [vmem:[%s6894_s3 + $0x30] sm:$0xf]  ;;  %v4387_v61 = vld [vmem:[%s6894_s3 + $0x28] sm:$0xf] }
  0x31   : > { %v5905_v9 = vsel %vm500_vm1, %v536_v52, %v537_v56  ;;  %v5908_v13 = vsel %vm1364_vm3, %v1400_v57, %v1401_v60 }
  0x32   : > { %4834 = vmatmul.mubr.msk.f32.gmra.mrb[8].mxu0 %vm543_vm2, %v5843_v21  ;;  %4938 = vmatmul.mubr.msk.f32.gmra.mrb[8].mxu1 %vm543_vm2, %v5846_v24  ;;  %v5919_v14 = vsel %vm500_vm1, %v537_v56, %v539_v7  ;;  %v5922_v15 = vsel %vm1364_vm3, %v1401_v60, %v1403_v8  ;;  %v4475_v7 = vld [vmem:[%s6894_s3 + $0x38] sm:$0xf] }
  0x33   : > { %4836 = vmatprep.mubr.msk.f32.mxu0 %vm543_vm2, %v5851_v32  ;;  %4940 = vmatprep.mubr.msk.f32.mxu1 %vm543_vm2, %v5854_v33 }
  0x36   : > { %4837 = vmatmul.mubr.msk.f32.gmra.mrb[10].mxu0 %vm543_vm2, %v5870_v44  ;;  %4941 = vmatmul.mubr.msk.f32.gmra.mrb[10].mxu1 %vm543_vm2, %v5873_v45 }
  0x37   : > { %4839 = vmatprep.mubr.msk.f32.mxu0 %vm543_vm2, %v5880_v49  ;;  %4943 = vmatprep.mubr.msk.f32.mxu1 %vm543_vm2, %v5884_v53 }
  0x3a   : > { %4840 = vmatmul.mubr.msk.f32.gmra.mrb[12].mxu0 %vm543_vm2, %v5899_v62  ;;  %4944 = vmatmul.mubr.msk.f32.gmra.mrb[12].mxu1 %vm543_vm2, %v5902_v6 }
  0x3b   : > { %4842 = vmatprep.mubr.msk.f32.mxu0 %vm543_vm2, %v5905_v9  ;;  %4946 = vmatprep.mubr.msk.f32.mxu1 %vm543_vm2, %v5908_v13 }
  0x3e   : > { %4843 = vmatmul.mubr.msk.f32.gmra.mrb[14].mxu0 %vm543_vm2, %v5919_v14  ;;  %4947 = vmatmul.mubr.msk.f32.gmra.mrb[14].mxu1 %vm543_vm2, %v5922_v15 }
  0x3f   : > { %4847 = vmatprep.mubr.msk.f32.mxu0 %vm543_vm2, %v5671_v4  ;;  %4951 = vmatprep.mubr.msk.f32.mxu1 %vm543_vm2, %v5691_v18  ;;  %v4352_v4 = vld [vmem:[%s6894_s3 + $0x24] sm:$0xf] }
  0x40   : > { %v6059_v18 = vld [vmem:[%s412_s14] sm:$0xff] }
  0x41   : > { %v1901_v51 = vrot.slane %v6059_v18, 2 }
  0x42   : > { %4848 = vmatmul.mubr.msk.f32.vlgmr.msra.gmra.mrb[0].mxu0 %vm543_vm2, %v5674_v5  ;;  %4952 = vmatmul.mubr.msk.f32.vlgmr.msra.gmra.mrb[0].mxu1 %vm543_vm2, %v5707_v25  ;;  %v4440_v5 = vld [vmem:[%s6894_s3 + $0x34] sm:$0xf]  ;;  %v6061_v25 = vld [vmem:[%s412_s14 + $0x8] sm:$0xff] }
  0x43   : > { %4872 = vmatpush3.msk.msra.mxu0 %vm576_vm0, %v5719_v30  ;;  %4976 = vmatpush3.msk.msra.mxu1 %vm576_vm0, %v5735_v36  ;;  %v471_v30 = vld [vmem:[%s412_s14 + $0x10] sm:$0x3]  ;;  %v1078_v36 = vrot.slane %v6059_v18, 1  ;;  %v1079_v26 = vrot.slane %v6061_v25, 1  ;;  %v1902_v52 = vrot.slane %v6061_v25, 2 }
  0x44   : > { %4850 = vmatprep.mubr.msk.f32.mxu0 %vm543_vm2, %v5682_v11  ;;  %4954 = vmatprep.mubr.msk.f32.mxu1 %vm543_vm2, %v5711_v27  ;;  %v1081_v28 = vrot.slane %v471_v30, 1  ;;  %v1904_v56 = vrot.slane %v471_v30, 2 }
  0x45   : > { %4897 = vmatprep.subr.msk.mxu0 %vm576_vm0, %v4245_v19  ;;  %5001 = vmatprep.subr.msk.mxu1 %vm576_vm0, %v4317_v20  ;;  %v6082_v34 = vsel %vm500_vm1, %v1078_v36, %v1079_v26  ;;  %v6164_v57 = vsel %vm1364_vm3, %v1901_v51, %v1902_v52 }
  0x46   : > { %4851 = vmatmul.mubr.msk.f32.gmra.mrb[2].mxu0 %vm543_vm2, %v5685_v12  ;;  %4955 = vmatmul.mubr.msk.f32.gmra.mrb[2].mxu1 %vm543_vm2, %v5740_v37  ;;  %v6093_v38 = vsel %vm500_vm1, %v1079_v26, %v1081_v28  ;;  %v6175_v60 = vsel %vm1364_vm3, %v1902_v52, %v1904_v56 }
  0x47   : > { %4853 = vmatprep.mubr.msk.f32.mxu0 %vm543_vm2, %v5697_v22  ;;  %4957 = vmatprep.mubr.msk.f32.mxu1 %vm543_vm2, %v5753_v43 }
  0x4a   : > { %4854 = vmatmul.mubr.msk.f32.gmra.mrb[4].mxu0 %vm543_vm2, %v5700_v23  ;;  %4958 = vmatmul.mubr.msk.f32.gmra.mrb[4].mxu1 %vm543_vm2, %v5781_v54 }
  0x4b   : > { %4856 = vmatprep.mubr.msk.f32.mxu0 %vm543_vm2, %v5714_v29  ;;  %4960 = vmatprep.mubr.msk.f32.mxu1 %vm543_vm2, %v5789_v58 }
  0x4e   : > { %4857 = vmatmul.mubr.msk.f32.gmra.mrb[6].mxu0 %vm543_vm2, %v5730_v35  ;;  %4961 = vmatmul.mubr.msk.f32.gmra.mrb[6].mxu1 %vm543_vm2, %v5808_v1 }
  0x4f   : > { %4859 = vmatprep.mubr.msk.f32.mxu0 %vm543_vm2, %v5757_v46  ;;  %4963 = vmatprep.mubr.msk.f32.mxu1 %vm543_vm2, %v5818_v3 }
  0x52   : > { %4860 = vmatmul.mubr.msk.f32.gmra.mrb[8].mxu0 %vm543_vm2, %v5760_v47  ;;  %4964 = vmatmul.mubr.msk.f32.gmra.mrb[8].mxu1 %vm543_vm2, %v5843_v21 }
  0x53   : > { %4862 = vmatprep.mubr.msk.f32.mxu0 %vm543_vm2, %v5798_v63  ;;  %4966 = vmatprep.mubr.msk.f32.mxu1 %vm543_vm2, %v5851_v32 }
  0x56   : > { %4863 = vmatmul.mubr.msk.f32.gmra.mrb[10].mxu0 %vm543_vm2, %v5801_v0  ;;  %4967 = vmatmul.mubr.msk.f32.gmra.mrb[10].mxu1 %vm543_vm2, %v5870_v44 }
  0x57   : > { %4865 = vmatprep.mubr.msk.f32.mxu0 %vm543_vm2, %v5829_v16  ;;  %4969 = vmatprep.mubr.msk.f32.mxu1 %vm543_vm2, %v5880_v49 }
  0x5a   : > { %4866 = vmatmul.mubr.msk.f32.gmra.mrb[12].mxu0 %vm543_vm2, %v5832_v17  ;;  %4970 = vmatmul.mubr.msk.f32.gmra.mrb[12].mxu1 %vm543_vm2, %v5899_v62 }
  0x5b   : > { %4868 = vmatprep.mubr.msk.f32.mxu0 %vm543_vm2, %v5860_v40  ;;  %4972 = vmatprep.mubr.msk.f32.mxu1 %vm543_vm2, %v5905_v9 }
  0x5e   : > { %4869 = vmatmul.mubr.msk.f32.gmra.mrb[14].mxu0 %vm543_vm2, %v5863_v41  ;;  %4973 = vmatmul.mubr.msk.f32.gmra.mrb[14].mxu1 %vm543_vm2, %v5919_v14 }
  0x5f   : > { %4873 = vmatprep.mubr.msk.f32.mxu0 %vm543_vm2, %v5682_v11  ;;  %4977 = vmatprep.mubr.msk.f32.mxu1 %vm543_vm2, %v5711_v27 }
  0x62   : > { %4874 = vmatmul.mubr.msk.f32.vlgmr.msra.gmra.mrb[0].mxu0 %vm543_vm2, %v5685_v12  ;;  %4978 = vmatmul.mubr.msk.f32.vlgmr.msra.gmra.mrb[0].mxu1 %vm543_vm2, %v5740_v37 }
  0x63   : > { %4898 = vmatpush3.msk.msra.mxu0 %vm576_vm0, %v4245_v19  ;;  %5002 = vmatpush3.msk.msra.mxu1 %vm576_vm0, %v4317_v20 }
  0x64   : > { %4876 = vmatprep.mubr.msk.f32.mxu0 %vm543_vm2, %v5697_v22  ;;  %4980 = vmatprep.mubr.msk.f32.mxu1 %vm543_vm2, %v5753_v43 }
  0x65   : > { %5027 = vmatprep.subr.msk.mxu0 %vm576_vm0, %v4352_v4  ;;  %5131 = vmatprep.subr.msk.mxu1 %vm576_vm0, %v4440_v5 }
  0x66   : > { %4877 = vmatmul.mubr.msk.f32.gmra.mrb[2].mxu0 %vm543_vm2, %v5700_v23  ;;  %4981 = vmatmul.mubr.msk.f32.gmra.mrb[2].mxu1 %vm543_vm2, %v5781_v54 }
  0x67   : > { %4879 = vmatprep.mubr.msk.f32.mxu0 %vm543_vm2, %v5714_v29  ;;  %4983 = vmatprep.mubr.msk.f32.mxu1 %vm543_vm2, %v5789_v58 }
  0x6a   : > { %4880 = vmatmul.mubr.msk.f32.gmra.mrb[4].mxu0 %vm543_vm2, %v5730_v35  ;;  %4984 = vmatmul.mubr.msk.f32.gmra.mrb[4].mxu1 %vm543_vm2, %v5808_v1 }
  0x6b   : > { %4882 = vmatprep.mubr.msk.f32.mxu0 %vm543_vm2, %v5757_v46  ;;  %4986 = vmatprep.mubr.msk.f32.mxu1 %vm543_vm2, %v5818_v3 }
  0x6e   : > { %4883 = vmatmul.mubr.msk.f32.gmra.mrb[6].mxu0 %vm543_vm2, %v5760_v47  ;;  %4987 = vmatmul.mubr.msk.f32.gmra.mrb[6].mxu1 %vm543_vm2, %v5843_v21 }
  0x6f   : > { %4885 = vmatprep.mubr.msk.f32.mxu0 %vm543_vm2, %v5798_v63  ;;  %4989 = vmatprep.mubr.msk.f32.mxu1 %vm543_vm2, %v5851_v32 }
  0x72   : > { %4886 = vmatmul.mubr.msk.f32.gmra.mrb[8].mxu0 %vm543_vm2, %v5801_v0  ;;  %4990 = vmatmul.mubr.msk.f32.gmra.mrb[8].mxu1 %vm543_vm2, %v5870_v44 }
  0x73   : > { %4888 = vmatprep.mubr.msk.f32.mxu0 %vm543_vm2, %v5829_v16  ;;  %4992 = vmatprep.mubr.msk.f32.mxu1 %vm543_vm2, %v5880_v49 }
  0x76   : > { %4889 = vmatmul.mubr.msk.f32.gmra.mrb[10].mxu0 %vm543_vm2, %v5832_v17  ;;  %4993 = vmatmul.mubr.msk.f32.gmra.mrb[10].mxu1 %vm543_vm2, %v5899_v62 }
  0x77   : > { %4891 = vmatprep.mubr.msk.f32.mxu0 %vm543_vm2, %v5860_v40  ;;  %4995 = vmatprep.mubr.msk.f32.mxu1 %vm543_vm2, %v5905_v9 }
  0x7a   : > { %4892 = vmatmul.mubr.msk.f32.gmra.mrb[12].mxu0 %vm543_vm2, %v5863_v41  ;;  %4996 = vmatmul.mubr.msk.f32.gmra.mrb[12].mxu1 %vm543_vm2, %v5919_v14 }
  0x7b   : > { %4894 = vmatprep.mubr.msk.f32.mxu0 %vm543_vm2, %v6059_v18  ;;  %4998 = vmatprep.mubr.msk.f32.mxu1 %vm543_vm2, %v6082_v34 }
  0x7e   : > { %4895 = vmatmul.mubr.msk.f32.gmra.mrb[14].mxu0 %vm543_vm2, %v6061_v25  ;;  %4999 = vmatmul.mubr.msk.f32.gmra.mrb[14].mxu1 %vm543_vm2, %v6093_v38 }
  0x7f   : > { %4899 = vmatprep.mubr.msk.f32.mxu0 %vm543_vm2, %v5711_v27  ;;  %5003 = vmatprep.mubr.msk.f32.mxu1 %vm543_vm2, %v5725_v31 }
  0x82   : > { %4900 = vmatmul.mubr.msk.f32.vlgmr.msra.gmra.mrb[0].mxu0 %vm543_vm2, %v5740_v37  ;;  %5004 = vmatmul.mubr.msk.f32.vlgmr.msra.gmra.mrb[0].mxu1 %vm543_vm2, %v5750_v42 }
  0x83   : > { %5028 = vmatpush3.msk.msra.mxu0 %vm576_vm0, %v4352_v4  ;;  %5132 = vmatpush3.msk.msra.mxu1 %vm576_vm0, %v4440_v5 }
  0x84   : > { %4902 = vmatprep.mubr.msk.f32.mxu0 %vm543_vm2, %v5753_v43  ;;  %5006 = vmatprep.mubr.msk.f32.mxu1 %vm543_vm2, %v5763_v48 }
  0x85   : > { %5053 = vmatprep.subr.msk.mxu0 %vm576_vm0, %v4351_v39  ;;  %5157 = vmatprep.subr.msk.mxu1 %vm576_vm0, %v4439_v50 }
  0x86   : > { %4903 = vmatmul.mubr.msk.f32.gmra.mrb[2].mxu0 %vm543_vm2, %v5781_v54  ;;  %5007 = vmatmul.mubr.msk.f32.gmra.mrb[2].mxu1 %vm543_vm2, %v5784_v55 }
  0x87   : > { %4905 = vmatprep.mubr.msk.f32.mxu0 %vm543_vm2, %v5789_v58  ;;  %5009 = vmatprep.mubr.msk.f32.mxu1 %vm543_vm2, %v5792_v59 }
  0x8a   : > { %4906 = vmatmul.mubr.msk.f32.gmra.mrb[4].mxu0 %vm543_vm2, %v5808_v1  ;;  %5010 = vmatmul.mubr.msk.f32.gmra.mrb[4].mxu1 %vm543_vm2, %v5811_v2 }
  0x8b   : > { %4908 = vmatprep.mubr.msk.f32.mxu0 %vm543_vm2, %v5818_v3  ;;  %5012 = vmatprep.mubr.msk.f32.mxu1 %vm543_vm2, %v5823_v10 }
  0x8e   : > { %4909 = vmatmul.mubr.msk.f32.gmra.mrb[6].mxu0 %vm543_vm2, %v5843_v21  ;;  %5013 = vmatmul.mubr.msk.f32.gmra.mrb[6].mxu1 %vm543_vm2, %v5846_v24 }
  0x8f   : > { %4911 = vmatprep.mubr.msk.f32.mxu0 %vm543_vm2, %v5851_v32  ;;  %5015 = vmatprep.mubr.msk.f32.mxu1 %vm543_vm2, %v5854_v33 }
  0x92   : > { %4912 = vmatmul.mubr.msk.f32.gmra.mrb[8].mxu0 %vm543_vm2, %v5870_v44  ;;  %5016 = vmatmul.mubr.msk.f32.gmra.mrb[8].mxu1 %vm543_vm2, %v5873_v45 }
  0x93   : > { %4914 = vmatprep.mubr.msk.f32.mxu0 %vm543_vm2, %v5880_v49  ;;  %5018 = vmatprep.mubr.msk.f32.mxu1 %vm543_vm2, %v5884_v53 }
  0x96   : > { %4915 = vmatmul.mubr.msk.f32.gmra.mrb[10].mxu0 %vm543_vm2, %v5899_v62  ;;  %5019 = vmatmul.mubr.msk.f32.gmra.mrb[10].mxu1 %vm543_vm2, %v5902_v6 }
  0x97   : > { %4917 = vmatprep.mubr.msk.f32.mxu0 %vm543_vm2, %v5905_v9  ;;  %5021 = vmatprep.mubr.msk.f32.mxu1 %vm543_vm2, %v5908_v13 }
  0x9a   : > { %4918 = vmatmul.mubr.msk.f32.gmra.mrb[12].mxu0 %vm543_vm2, %v5919_v14  ;;  %5022 = vmatmul.mubr.msk.f32.gmra.mrb[12].mxu1 %vm543_vm2, %v5922_v15 }
  0x9b   : > { %4920 = vmatprep.mubr.msk.f32.mxu0 %vm543_vm2, %v6082_v34  ;;  %5024 = vmatprep.mubr.msk.f32.mxu1 %vm543_vm2, %v6164_v57 }
  0x9e   : > { %4921 = vmatmul.mubr.msk.f32.gmra.mrb[14].mxu0 %vm543_vm2, %v6093_v38  ;;  %5025 = vmatmul.mubr.msk.f32.gmra.mrb[14].mxu1 %vm543_vm2, %v6175_v60 }
  0x9f   : > { %5029 = vmatprep.mubr.msk.f32.mxu0 %vm543_vm2, %v5711_v27  ;;  %5133 = vmatprep.mubr.msk.f32.mxu1 %vm543_vm2, %v5725_v31  ;;  %v4405_v31 = vld [vmem:[%s6894_s3 + $0x2c] sm:$0xf] }
  0xa2   : > { %5030 = vmatmul.mubr.msk.f32.vlgmr.msra.gmra.mrb[16].mxu0 %vm543_vm2, %v5740_v37  ;;  %5134 = vmatmul.mubr.msk.f32.vlgmr.msra.gmra.mrb[16].mxu1 %vm543_vm2, %v5750_v42  ;;  %v4493_v42 = vld [vmem:[%s6894_s3 + $0x3c] sm:$0xf] }
  0xa3   : > { %5054 = vmatpush3.msk.msra.mxu0 %vm576_vm0, %v4351_v39  ;;  %5158 = vmatpush3.msk.msra.mxu1 %vm576_vm0, %v4439_v50 }
  0xa4   : > { %5032 = vmatprep.mubr.msk.f32.mxu0 %vm543_vm2, %v5753_v43  ;;  %5136 = vmatprep.mubr.msk.f32.mxu1 %vm543_vm2, %v5763_v48 }
  0xa5   : > { %5079 = vmatprep.subr.msk.mxu0 %vm576_vm0, %v4387_v61  ;;  %5183 = vmatprep.subr.msk.mxu1 %vm576_vm0, %v4475_v7 }
  0xa6   : > { %5033 = vmatmul.mubr.msk.f32.gmra.mrb[18].mxu0 %vm543_vm2, %v5781_v54  ;;  %5137 = vmatmul.mubr.msk.f32.gmra.mrb[18].mxu1 %vm543_vm2, %v5784_v55 }
  0xa7   : > { %5035 = vmatprep.mubr.msk.f32.mxu0 %vm543_vm2, %v5789_v58  ;;  %5139 = vmatprep.mubr.msk.f32.mxu1 %vm543_vm2, %v5792_v59 }
  0xaa   : > { %5036 = vmatmul.mubr.msk.f32.gmra.mrb[20].mxu0 %vm543_vm2, %v5808_v1  ;;  %5140 = vmatmul.mubr.msk.f32.gmra.mrb[20].mxu1 %vm543_vm2, %v5811_v2 }
  0xab   : > { %5038 = vmatprep.mubr.msk.f32.mxu0 %vm543_vm2, %v5818_v3  ;;  %5142 = vmatprep.mubr.msk.f32.mxu1 %vm543_vm2, %v5823_v10 }
  0xae   : > { %5039 = vmatmul.mubr.msk.f32.gmra.mrb[22].mxu0 %vm543_vm2, %v5843_v21  ;;  %5143 = vmatmul.mubr.msk.f32.gmra.mrb[22].mxu1 %vm543_vm2, %v5846_v24 }
  0xaf   : > { %5041 = vmatprep.mubr.msk.f32.mxu0 %vm543_vm2, %v5851_v32  ;;  %5145 = vmatprep.mubr.msk.f32.mxu1 %vm543_vm2, %v5854_v33 }
  0xb2   : > { %5042 = vmatmul.mubr.msk.f32.gmra.mrb[24].mxu0 %vm543_vm2, %v5870_v44  ;;  %5146 = vmatmul.mubr.msk.f32.gmra.mrb[24].mxu1 %vm543_vm2, %v5873_v45 }
  0xb3   : > { %5044 = vmatprep.mubr.msk.f32.mxu0 %vm543_vm2, %v5880_v49  ;;  %5148 = vmatprep.mubr.msk.f32.mxu1 %vm543_vm2, %v5884_v53 }
  0xb6   : > { %5045 = vmatmul.mubr.msk.f32.gmra.mrb[26].mxu0 %vm543_vm2, %v5899_v62  ;;  %5149 = vmatmul.mubr.msk.f32.gmra.mrb[26].mxu1 %vm543_vm2, %v5902_v6 }
  0xb7   : > { %5047 = vmatprep.mubr.msk.f32.mxu0 %vm543_vm2, %v5905_v9  ;;  %5151 = vmatprep.mubr.msk.f32.mxu1 %vm543_vm2, %v5908_v13 }
  0xba   : > { %5048 = vmatmul.mubr.msk.f32.gmra.mrb[28].mxu0 %vm543_vm2, %v5919_v14  ;;  %5152 = vmatmul.mubr.msk.f32.gmra.mrb[28].mxu1 %vm543_vm2, %v5922_v15 }
  0xbb   : > { %5050 = vmatprep.mubr.msk.f32.mxu0 %vm543_vm2, %v6082_v34  ;;  %5154 = vmatprep.mubr.msk.f32.mxu1 %vm543_vm2, %v6164_v57 }
  0xbe   : > { %5051 = vmatmul.mubr.msk.f32.gmra.mrb[30].mxu0 %vm543_vm2, %v6093_v38  ;;  %5155 = vmatmul.mubr.msk.f32.gmra.mrb[30].mxu1 %vm543_vm2, %v6175_v60 }
  0xbf   : > { %5055 = vmatprep.mubr.msk.f32.mxu0 %vm543_vm2, %v5682_v11  ;;  %5159 = vmatprep.mubr.msk.f32.mxu1 %vm543_vm2, %v5711_v27  ;;  %v472_v11 = vld [vmem:[%s426_s30] sm:$0xff] }
  0xc2   : > { %5056 = vmatmul.mubr.msk.f32.vlgmr.msra.gmra.mrb[16].mxu0 %vm543_vm2, %v5685_v12  ;;  %5160 = vmatmul.mubr.msk.f32.vlgmr.msra.gmra.mrb[16].mxu1 %vm543_vm2, %v5740_v37  ;;  %v473_v12 = vld [vmem:[%s426_s30 + $0x8] sm:$0xff] }
  0xc3   : > { %5080 = vmatpush3.msk.msra.mxu0 %vm576_vm0, %v4387_v61  ;;  %5184 = vmatpush3.msk.msra.mxu1 %vm576_vm0, %v4475_v7  ;;  %v2659_v27 = vrot.slane %v473_v12, 1 }
  0xc4   : > { %5058 = vmatprep.mubr.msk.f32.mxu0 %vm543_vm2, %v5697_v22  ;;  %5162 = vmatprep.mubr.msk.f32.mxu1 %vm543_vm2, %v5753_v43 }
  0xc5   : > { %5105 = vmatprep.subr.msk.mxu0 %vm576_vm0, %v4405_v31  ;;  %5209 = vmatprep.subr.msk.mxu1 %vm576_vm0, %v4493_v42 }
  0xc6   : > { %5059 = vmatmul.mubr.msk.f32.gmra.mrb[18].mxu0 %vm543_vm2, %v5700_v23  ;;  %5163 = vmatmul.mubr.msk.f32.gmra.mrb[18].mxu1 %vm543_vm2, %v5781_v54 }
  0xc7   : > { %5061 = vmatprep.mubr.msk.f32.mxu0 %vm543_vm2, %v5714_v29  ;;  %5165 = vmatprep.mubr.msk.f32.mxu1 %vm543_vm2, %v5789_v58 }
  0xca   : > { %5062 = vmatmul.mubr.msk.f32.gmra.mrb[20].mxu0 %vm543_vm2, %v5730_v35  ;;  %5166 = vmatmul.mubr.msk.f32.gmra.mrb[20].mxu1 %vm543_vm2, %v5808_v1 }
  0xcb   : > { %5064 = vmatprep.mubr.msk.f32.mxu0 %vm543_vm2, %v5757_v46  ;;  %5168 = vmatprep.mubr.msk.f32.mxu1 %vm543_vm2, %v5818_v3 }
  0xce   : > { %5065 = vmatmul.mubr.msk.f32.gmra.mrb[22].mxu0 %vm543_vm2, %v5760_v47  ;;  %5169 = vmatmul.mubr.msk.f32.gmra.mrb[22].mxu1 %vm543_vm2, %v5843_v21 }
  0xcf   : > { %5067 = vmatprep.mubr.msk.f32.mxu0 %vm543_vm2, %v5798_v63  ;;  %5171 = vmatprep.mubr.msk.f32.mxu1 %vm543_vm2, %v5851_v32 }
  0xd2   : > { %5068 = vmatmul.mubr.msk.f32.gmra.mrb[24].mxu0 %vm543_vm2, %v5801_v0  ;;  %5172 = vmatmul.mubr.msk.f32.gmra.mrb[24].mxu1 %vm543_vm2, %v5870_v44 }
  0xd3   : > { %5070 = vmatprep.mubr.msk.f32.mxu0 %vm543_vm2, %v5829_v16  ;;  %5174 = vmatprep.mubr.msk.f32.mxu1 %vm543_vm2, %v5880_v49 }
  0xd6   : > { %5071 = vmatmul.mubr.msk.f32.gmra.mrb[26].mxu0 %vm543_vm2, %v5832_v17  ;;  %5175 = vmatmul.mubr.msk.f32.gmra.mrb[26].mxu1 %vm543_vm2, %v5899_v62 }
  0xd7   : > { %5073 = vmatprep.mubr.msk.f32.mxu0 %vm543_vm2, %v5860_v40  ;;  %5177 = vmatprep.mubr.msk.f32.mxu1 %vm543_vm2, %v5905_v9 }
  0xda   : > { %5074 = vmatmul.mubr.msk.f32.gmra.mrb[28].mxu0 %vm543_vm2, %v5863_v41  ;;  %5178 = vmatmul.mubr.msk.f32.gmra.mrb[28].mxu1 %vm543_vm2, %v5919_v14 }
  0xdb   : > { %5076 = vmatprep.mubr.msk.f32.mxu0 %vm543_vm2, %v6059_v18  ;;  %5180 = vmatprep.mubr.msk.f32.mxu1 %vm543_vm2, %v6082_v34 }
  0xde   : > { %5077 = vmatmul.mubr.msk.f32.gmra.mrb[30].mxu0 %vm543_vm2, %v6061_v25  ;;  %5181 = vmatmul.mubr.msk.f32.gmra.mrb[30].mxu1 %vm543_vm2, %v6093_v38 }
  0xdf   : > { %5081 = vmatprep.mubr.msk.f32.mxu0 %vm543_vm2, %v5697_v22  ;;  %5185 = vmatprep.mubr.msk.f32.mxu1 %vm543_vm2, %v5753_v43  ;;  %v474_v22 = vld [vmem:[%s426_s30 + $0x10] sm:$0x3]  ;;  %s4531_s30 = sshll.u32 (%p5624_p5), %s3715_s8, 3 }
  0xe0   : > { %s6749_s21 = scalar_lea.vmem (%p5624_p5), %s6895_s4, %s4531_s30 }
  0xe2   : > { %5082 = vmatmul.mubr.msk.f32.vlgmr.msra.gmra.mrb[16].mxu0 %vm543_vm2, %v5700_v23  ;;  %5186 = vmatmul.mubr.msk.f32.vlgmr.msra.gmra.mrb[16].mxu1 %vm543_vm2, %v5781_v54  ;;  %v2658_v23 = vrot.slane %v472_v11, 1 }
  0xe3   : > { %5106 = vmatpush3.msk.msra.mxu0 %vm576_vm0, %v4405_v31  ;;  %5210 = vmatpush3.msk.msra.mxu1 %vm576_vm0, %v4493_v42 }
  0xe4   : > { %5084 = vmatprep.mubr.msk.f32.mxu0 %vm543_vm2, %v5714_v29  ;;  %5188 = vmatprep.mubr.msk.f32.mxu1 %vm543_vm2, %v5789_v58  ;;  %v2661_v29 = vrot.slane %v474_v22, 1 }
  0xe6   : > { %5085 = vmatmul.mubr.msk.f32.gmra.mrb[18].mxu0 %vm543_vm2, %v5730_v35  ;;  %5189 = vmatmul.mubr.msk.f32.gmra.mrb[18].mxu1 %vm543_vm2, %v5808_v1  ;;  %v2660_v35 = vsel %vm500_vm1, %v2658_v23, %v2659_v27  ;;  %v2662_v37 = vsel %vm500_vm1, %v2659_v27, %v2661_v29 }
  0xe7   : > { %5087 = vmatprep.mubr.msk.f32.mxu0 %vm543_vm2, %v5757_v46  ;;  %5191 = vmatprep.mubr.msk.f32.mxu1 %vm543_vm2, %v5818_v3  ;;  %v3409_v46 = vrot.slane %v473_v12, 2 }
  0xea   : > { %5088 = vmatmul.mubr.msk.f32.gmra.mrb[20].mxu0 %vm543_vm2, %v5760_v47  ;;  %5192 = vmatmul.mubr.msk.f32.gmra.mrb[20].mxu1 %vm543_vm2, %v5843_v21  ;;  %v3411_v47 = vrot.slane %v474_v22, 2 }
  0xeb   : > { %5090 = vmatprep.mubr.msk.f32.mxu0 %vm543_vm2, %v5798_v63  ;;  %5194 = vmatprep.mubr.msk.f32.mxu1 %vm543_vm2, %v5851_v32 }
  0xee   : > { %5091 = vmatmul.mubr.msk.f32.gmra.mrb[22].mxu0 %vm543_vm2, %v5801_v0  ;;  %5195 = vmatmul.mubr.msk.f32.gmra.mrb[22].mxu1 %vm543_vm2, %v5870_v44 }
  0xef   : > { %5093 = vmatprep.mubr.msk.f32.mxu0 %vm543_vm2, %v5829_v16  ;;  %5197 = vmatprep.mubr.msk.f32.mxu1 %vm543_vm2, %v5880_v49 }
  0xf2   : > { %5094 = vmatmul.mubr.msk.f32.gmra.mrb[24].mxu0 %vm543_vm2, %v5832_v17  ;;  %5198 = vmatmul.mubr.msk.f32.gmra.mrb[24].mxu1 %vm543_vm2, %v5899_v62 }
  0xf3   : > { %5096 = vmatprep.mubr.msk.f32.mxu0 %vm543_vm2, %v5860_v40  ;;  %5200 = vmatprep.mubr.msk.f32.mxu1 %vm543_vm2, %v5905_v9 }
  0xf6   : > { %5097 = vmatmul.mubr.msk.f32.gmra.mrb[26].mxu0 %vm543_vm2, %v5863_v41  ;;  %5201 = vmatmul.mubr.msk.f32.gmra.mrb[26].mxu1 %vm543_vm2, %v5919_v14 }
  0xf7   : > { %5099 = vmatprep.mubr.msk.f32.mxu0 %vm543_vm2, %v6059_v18  ;;  %5203 = vmatprep.mubr.msk.f32.mxu1 %vm543_vm2, %v6082_v34 }
  0xfa   : > { %5100 = vmatmul.mubr.msk.f32.gmra.mrb[28].mxu0 %vm543_vm2, %v6061_v25  ;;  %5204 = vmatmul.mubr.msk.f32.gmra.mrb[28].mxu1 %vm543_vm2, %v6093_v38 }
  0xfb   : > { %5102 = vmatprep.mubr.msk.f32.mxu0 %vm543_vm2, %v472_v11  ;;  %5206 = vmatprep.mubr.msk.f32.mxu1 %vm543_vm2, %v2660_v35 }
  0xfe   : > { %5103 = vmatmul.mubr.msk.f32.gmra.mrb[30].mxu0 %vm543_vm2, %v473_v12  ;;  %5207 = vmatmul.mubr.msk.f32.gmra.mrb[30].mxu1 %vm543_vm2, %v2662_v37 }
  0xff   : > { %5107 = vmatprep.mubr.msk.f32.mxu0 %vm543_vm2, %v5753_v43  ;;  %5211 = vmatprep.mubr.msk.f32.mxu1 %vm543_vm2, %v5763_v48  ;;  %v3408_v43 = vrot.slane %v472_v11, 2 }
 0x101   : > { %v3410_v48 = vsel %vm1364_vm3, %v3408_v43, %v3409_v46 }
 0x102   : > { %5108 = vmatmul.mubr.msk.f32.vlgmr.msra.gmra.mrb[16].mxu0 %vm543_vm2, %v5781_v54  ;;  %5212 = vmatmul.mubr.msk.f32.vlgmr.msra.gmra.mrb[16].mxu1 %vm543_vm2, %v5784_v55  ;;  %v3412_v54 = vsel %vm1364_vm3, %v3409_v46, %v3411_v47 }
 0x103   : > { %5110 = vmatprep.mubr.msk.f32.mxu0 %vm543_vm2, %v5789_v58  ;;  %5214 = vmatprep.mubr.msk.f32.mxu1 %vm543_vm2, %v5792_v59 }
 0x106   : > { %5111 = vmatmul.mubr.msk.f32.gmra.mrb[18].mxu0 %vm543_vm2, %v5808_v1  ;;  %5215 = vmatmul.mubr.msk.f32.gmra.mrb[18].mxu1 %vm543_vm2, %v5811_v2 }
 0x107   : > { %5113 = vmatprep.mubr.msk.f32.mxu0 %vm543_vm2, %v5818_v3  ;;  %5217 = vmatprep.mubr.msk.f32.mxu1 %vm543_vm2, %v5823_v10 }
 0x10a   : > { %5114 = vmatmul.mubr.msk.f32.gmra.mrb[20].mxu0 %vm543_vm2, %v5843_v21  ;;  %5218 = vmatmul.mubr.msk.f32.gmra.mrb[20].mxu1 %vm543_vm2, %v5846_v24 }
 0x10b   : > { %5116 = vmatprep.mubr.msk.f32.mxu0 %vm543_vm2, %v5851_v32  ;;  %5220 = vmatprep.mubr.msk.f32.mxu1 %vm543_vm2, %v5854_v33 }
 0x10e   : > { %5117 = vmatmul.mubr.msk.f32.gmra.mrb[22].mxu0 %vm543_vm2, %v5870_v44  ;;  %5221 = vmatmul.mubr.msk.f32.gmra.mrb[22].mxu1 %vm543_vm2, %v5873_v45 }
 0x10f   : > { %5119 = vmatprep.mubr.msk.f32.mxu0 %vm543_vm2, %v5880_v49  ;;  %5223 = vmatprep.mubr.msk.f32.mxu1 %vm543_vm2, %v5884_v53 }
 0x112   : > { %5120 = vmatmul.mubr.msk.f32.gmra.mrb[24].mxu0 %vm543_vm2, %v5899_v62  ;;  %5224 = vmatmul.mubr.msk.f32.gmra.mrb[24].mxu1 %vm543_vm2, %v5902_v6 }
 0x113   : > { %5122 = vmatprep.mubr.msk.f32.mxu0 %vm543_vm2, %v5905_v9  ;;  %5226 = vmatprep.mubr.msk.f32.mxu1 %vm543_vm2, %v5908_v13 }
 0x116   : > { %5123 = vmatmul.mubr.msk.f32.gmra.mrb[26].mxu0 %vm543_vm2, %v5919_v14  ;;  %5227 = vmatmul.mubr.msk.f32.gmra.mrb[26].mxu1 %vm543_vm2, %v5922_v15 }
 0x117   : > { %5125 = vmatprep.mubr.msk.f32.mxu0 %vm543_vm2, %v6082_v34  ;;  %5229 = vmatprep.mubr.msk.f32.mxu1 %vm543_vm2, %v6164_v57 }
 0x11a   : > { %5126 = vmatmul.mubr.msk.f32.gmra.mrb[28].mxu0 %vm543_vm2, %v6093_v38  ;;  %5230 = vmatmul.mubr.msk.f32.gmra.mrb[28].mxu1 %vm543_vm2, %v6175_v60 }
 0x11b   : > { %5128 = vmatprep.mubr.msk.f32.mxu0 %vm543_vm2, %v2660_v35  ;;  %5232 = vmatprep.mubr.msk.f32.mxu1 %vm543_vm2, %v3410_v48 }
 0x11e   : > { %5129 = vmatmul.mubr.msk.f32.gmra.mrb[30].mxu0 %vm543_vm2, %v2662_v37  ;;  %5233 = vmatmul.mubr.msk.f32.gmra.mrb[30].mxu1 %vm543_vm2, %v3412_v54 }
 0x155   : > { %v4901_v55 = vpop.f32.mrb[0].mxu0  ;;  %v5005_v58 = vpop.f32.mrb[0].mxu1 }
 0x156   : > { %1255 = vst.msk [vmem:[%s6461_s11 + $0x8] sm:$0xff] %vm1253_vm4, %v4901_v55  ;;  %v1271_v59 = vsel %vm1253_vm4, %v4901_v55, 0.0  ;;  %v1309_v63 = vmul.f32 %v4901_v55, %v4901_v55  ;;  %4336 = vst.msk [vmem:[%s6461_s11 + $0x88] sm:$0xff] %vm1253_vm4, %v5005_v58  ;;  %v2094_v0 = vsel %vm1253_vm4, %v5005_v58, 0.0  ;;  %v2132_v1 = vmul.f32 %v5005_v58, %v5005_v58  ;;  %v1158_v2 = vpop.f32.mrb[1].mxu0  ;;  %v1981_v3 = vpop.f32.mrb[1].mxu1 }
 0x157   : > { %1254 = vst.msk [vmem:[%s6461_s11] sm:$0xff] %vm1253_vm4, %v1158_v2  ;;  %v1270_v10 = vsel %vm1253_vm4, %v1158_v2, 0.0  ;;  %v1308_v16 = vmul.f32 %v1158_v2, %v1158_v2  ;;  %4335 = vst.msk [vmem:[%s6461_s11 + $0x80] sm:$0xff] %vm1253_vm4, %v1981_v3  ;;  %v2093_v17 = vsel %vm1253_vm4, %v1981_v3, 0.0  ;;  %v2131_v21 = vmul.f32 %v1981_v3, %v1981_v3 }
 0x158   : > { %v1325_v24 = vsel %vm1253_vm4, %v1309_v63, 0.0  ;;  %v2148_v32 = vsel %vm1253_vm4, %v2132_v1, 0.0  ;;  %v1272_v33 = vadd.f32 %v1271_v59, %v1270_v10  ;;  %v2095_v40 = vadd.f32 %v2094_v0, %v2093_v17 }
 0x159   : > { %v1324_v41 = vsel %vm1253_vm4, %v1308_v16, 0.0  ;;  %v2147_v44 = vsel %vm1253_vm4, %v2131_v21, 0.0  ;;  %v4904_v45 = vpop.f32.mrb[2].mxu0  ;;  %v5008_v49 = vpop.f32.mrb[2].mxu1 }
 0x15a   : > { %v1326_v53 = vadd.f32 %v1325_v24, %v1324_v41  ;;  %v2149_v62 = vadd.f32 %v2148_v32, %v2147_v44  ;;  %1257 = vst.msk [vmem:[%s6461_s11 + $0x18] sm:$0xff] %vm1253_vm4, %v4904_v45  ;;  %4338 = vst.msk [vmem:[%s6461_s11 + $0x98] sm:$0xff] %vm1253_vm4, %v5008_v49  ;;  %v1168_v6 = vpop.f32.mrb[3].mxu0  ;;  %v1991_v8 = vpop.f32.mrb[3].mxu1  ;;  %v1311_v9 = vmul.f32 %v4904_v45, %v4904_v45  ;;  %v1275_v36 = vsel %vm1253_vm4, %v4904_v45, 0.0 }
 0x15b   : > { %1256 = vst.msk [vmem:[%s6461_s11 + $0x10] sm:$0xff] %vm1253_vm4, %v1168_v6  ;;  %v1273_v13 = vsel %vm1253_vm4, %v1168_v6, 0.0  ;;  %v1310_v14 = vmul.f32 %v1168_v6, %v1168_v6  ;;  %4337 = vst.msk [vmem:[%s6461_s11 + $0x90] sm:$0xff] %vm1253_vm4, %v1991_v8  ;;  %v2134_v15 = vmul.f32 %v5008_v49, %v5008_v49  ;;  %v2096_v20 = vsel %vm1253_vm4, %v1991_v8, 0.0 }
 0x15c   : > { %v1274_v19 = vadd.f32 %v1273_v13, %v1272_v33  ;;  %v2133_v4 = vmul.f32 %v1991_v8, %v1991_v8  ;;  %v2097_v18 = vadd.f32 %v2096_v20, %v2095_v40  ;;  %v2098_v26 = vsel %vm1253_vm4, %v5008_v49, 0.0 }
 0x15d   : > { %v1327_v5 = vsel %vm1253_vm4, %v1310_v14, 0.0  ;;  %v4907_v25 = vpop.f32.mrb[4].mxu0  ;;  %v5011_v30 = vpop.f32.mrb[4].mxu1  ;;  %v1329_v50 = vsel %vm1253_vm4, %v1311_v9, 0.0  ;;  %v2152_v57 = vsel %vm1253_vm4, %v2134_v15, 0.0 }
 0x15e   : > { %v1328_v28 = vadd.f32 %v1327_v5, %v1326_v53  ;;  %v2150_v34 = vsel %vm1253_vm4, %v2133_v4, 0.0  ;;  %1259 = vst.msk [vmem:[%s6461_s11 + $0x28] sm:$0xff] %vm1253_vm4, %v4907_v25  ;;  %4340 = vst.msk [vmem:[%s6461_s11 + $0xa8] sm:$0xff] %vm1253_vm4, %v5011_v30  ;;  %v1178_v38 = vpop.f32.mrb[5].mxu0  ;;  %v2001_v39 = vpop.f32.mrb[5].mxu1  ;;  %v1313_v52 = vmul.f32 %v4907_v25, %v4907_v25  ;;  %v1276_v56 = vadd.f32 %v1275_v36, %v1274_v19 }
 0x15f   : > { %v2151_v51 = vadd.f32 %v2150_v34, %v2149_v62  ;;  %1258 = vst.msk [vmem:[%s6461_s11 + $0x20] sm:$0xff] %vm1253_vm4, %v1178_v38  ;;  %4339 = vst.msk [vmem:[%s6461_s11 + $0xa0] sm:$0xff] %vm1253_vm4, %v2001_v39  ;;  %v1277_v60 = vsel %vm1253_vm4, %v1178_v38, 0.0  ;;  %v1312_v61 = vmul.f32 %v1178_v38, %v1178_v38  ;;  %v2136_v31 = vmul.f32 %v5011_v30, %v5011_v30 }
 0x160   : > { %v1330_v7 = vadd.f32 %v1329_v50, %v1328_v28  ;;  %v1278_v42 = vadd.f32 %v1277_v60, %v1276_v56  ;;  %v2099_v11 = vadd.f32 %v2098_v26, %v2097_v18  ;;  %v2100_v12 = vsel %vm1253_vm4, %v2001_v39, 0.0 }
 0x161   : > { %v4910_v22 = vpop.f32.mrb[6].mxu0  ;;  %v5014_v23 = vpop.f32.mrb[6].mxu1  ;;  %v1279_v27 = vsel %vm1253_vm4, %v4907_v25, 0.0  ;;  %v1331_v29 = vsel %vm1253_vm4, %v1312_v61, 0.0  ;;  %v2135_v35 = vmul.f32 %v2001_v39, %v2001_v39  ;;  %v2153_v37 = vadd.f32 %v2152_v57, %v2151_v51 }
 0x162   : > { %1261 = vst.msk [vmem:[%s6461_s11 + $0x38] sm:$0xff] %vm1253_vm4, %v4910_v22  ;;  %4342 = vst.msk [vmem:[%s6461_s11 + $0xb8] sm:$0xff] %vm1253_vm4, %v5014_v23  ;;  %v1188_v43 = vpop.f32.mrb[7].mxu0  ;;  %v2011_v46 = vpop.f32.mrb[7].mxu1  ;;  %v1333_v47 = vsel %vm1253_vm4, %v1313_v52, 0.0  ;;  %v2102_v48 = vsel %vm1253_vm4, %v5011_v30, 0.0  ;;  %v1332_v54 = vadd.f32 %v1331_v29, %v1330_v7  ;;  %v2101_v55 = vadd.f32 %v2100_v12, %v2099_v11 }
 0x163   : > { %1260 = vst.msk [vmem:[%s6461_s11 + $0x30] sm:$0xff] %vm1253_vm4, %v1188_v43  ;;  %4341 = vst.msk [vmem:[%s6461_s11 + $0xb0] sm:$0xff] %vm1253_vm4, %v2011_v46  ;;  %v2154_v58 = vsel %vm1253_vm4, %v2135_v35, 0.0  ;;  %v1315_v59 = vmul.f32 %v4910_v22, %v4910_v22  ;;  %v1280_v63 = vadd.f32 %v1279_v27, %v1278_v42  ;;  %v1281_v0 = vsel %vm1253_vm4, %v1188_v43, 0.0 }
 0x164   : > { %v2156_v1 = vsel %vm1253_vm4, %v2136_v31, 0.0  ;;  %v2155_v2 = vadd.f32 %v2154_v58, %v2153_v37  ;;  %v1314_v3 = vmul.f32 %v1188_v43, %v1188_v43  ;;  %v1334_v10 = vadd.f32 %v1333_v47, %v1332_v54 }
 0x165   : > { %v4913_v16 = vpop.f32.mrb[8].mxu0  ;;  %v5017_v17 = vpop.f32.mrb[8].mxu1  ;;  %v2138_v21 = vmul.f32 %v5014_v23, %v5014_v23  ;;  %v1282_v24 = vadd.f32 %v1281_v0, %v1280_v63  ;;  %v2103_v32 = vadd.f32 %v2102_v48, %v2101_v55  ;;  %v2104_v33 = vsel %vm1253_vm4, %v2011_v46, 0.0 }
 0x166   : > { %1263 = vst.msk [vmem:[%s6461_s11 + $0x48] sm:$0xff] %vm1253_vm4, %v4913_v16  ;;  %4344 = vst.msk [vmem:[%s6461_s11 + $0xc8] sm:$0xff] %vm1253_vm4, %v5017_v17  ;;  %v1198_v40 = vpop.f32.mrb[9].mxu0  ;;  %v2021_v41 = vpop.f32.mrb[9].mxu1  ;;  %v1283_v44 = vsel %vm1253_vm4, %v4910_v22, 0.0  ;;  %v1335_v45 = vsel %vm1253_vm4, %v1314_v3, 0.0  ;;  %v2137_v49 = vmul.f32 %v2011_v46, %v2011_v46  ;;  %v2157_v53 = vadd.f32 %v2156_v1, %v2155_v2 }
 0x167   : > { %1262 = vst.msk [vmem:[%s6461_s11 + $0x40] sm:$0xff] %vm1253_vm4, %v1198_v40  ;;  %4343 = vst.msk [vmem:[%s6461_s11 + $0xc0] sm:$0xff] %vm1253_vm4, %v2021_v41  ;;  %v1337_v62 = vsel %vm1253_vm4, %v1315_v59, 0.0  ;;  %v2106_v6 = vsel %vm1253_vm4, %v5014_v23, 0.0  ;;  %v1336_v8 = vadd.f32 %v1335_v45, %v1334_v10  ;;  %v2105_v9 = vadd.f32 %v2104_v33, %v2103_v32 }
 0x168   : > { %v2158_v13 = vsel %vm1253_vm4, %v2137_v49, 0.0  ;;  %v1317_v14 = vmul.f32 %v4913_v16, %v4913_v16  ;;  %v1284_v15 = vadd.f32 %v1283_v44, %v1282_v24  ;;  %v1285_v19 = vsel %vm1253_vm4, %v1198_v40, 0.0 }
 0x169   : > { %v4916_v20 = vpop.f32.mrb[10].mxu0  ;;  %v5020_v4 = vpop.f32.mrb[10].mxu1  ;;  %v2160_v5 = vsel %vm1253_vm4, %v2138_v21, 0.0  ;;  %v2159_v18 = vadd.f32 %v2158_v13, %v2157_v53  ;;  %v1316_v25 = vmul.f32 %v1198_v40, %v1198_v40  ;;  %v1338_v30 = vadd.f32 %v1337_v62, %v1336_v8 }
 0x16a   : > { %1265 = vst.msk [vmem:[%s6461_s11 + $0x58] sm:$0xff] %vm1253_vm4, %v4916_v20  ;;  %4346 = vst.msk [vmem:[%s6461_s11 + $0xd8] sm:$0xff] %vm1253_vm4, %v5020_v4  ;;  %v1208_v36 = vpop.f32.mrb[11].mxu0  ;;  %v2031_v26 = vpop.f32.mrb[11].mxu1  ;;  %v2140_v28 = vmul.f32 %v5017_v17, %v5017_v17  ;;  %v1286_v34 = vadd.f32 %v1285_v19, %v1284_v15  ;;  %v2107_v38 = vadd.f32 %v2106_v6, %v2105_v9  ;;  %v2108_v39 = vsel %vm1253_vm4, %v2021_v41, 0.0 }
 0x16b   : > { %1264 = vst.msk [vmem:[%s6461_s11 + $0x50] sm:$0xff] %vm1253_vm4, %v1208_v36  ;;  %4345 = vst.msk [vmem:[%s6461_s11 + $0xd0] sm:$0xff] %vm1253_vm4, %v2031_v26  ;;  %v1287_v50 = vsel %vm1253_vm4, %v4913_v16, 0.0  ;;  %v1339_v51 = vsel %vm1253_vm4, %v1316_v25, 0.0  ;;  %v2139_v52 = vmul.f32 %v2021_v41, %v2021_v41  ;;  %v2161_v56 = vadd.f32 %v2160_v5, %v2159_v18 }
 0x16c   : > { %v1341_v57 = vsel %vm1253_vm4, %v1317_v14, 0.0  ;;  %v2110_v60 = vsel %vm1253_vm4, %v5017_v17, 0.0  ;;  %v1340_v61 = vadd.f32 %v1339_v51, %v1338_v30  ;;  %v2109_v7 = vadd.f32 %v2108_v39, %v2107_v38 }
 0x16d   : > { %v4919_v31 = vpop.f32.mrb[12].mxu0  ;;  %v5023_v42 = vpop.f32.mrb[12].mxu1  ;;  %v2162_v11 = vsel %vm1253_vm4, %v2139_v52, 0.0  ;;  %v1319_v12 = vmul.f32 %v4916_v20, %v4916_v20  ;;  %v1288_v22 = vadd.f32 %v1287_v50, %v1286_v34  ;;  %v1289_v23 = vsel %vm1253_vm4, %v1208_v36, 0.0 }
 0x16e   : > { %1267 = vst.msk [vmem:[%s6461_s11 + $0x68] sm:$0xff] %vm1253_vm4, %v4919_v31  ;;  %4348 = vst.msk [vmem:[%s6461_s11 + $0xe8] sm:$0xff] %vm1253_vm4, %v5023_v42  ;;  %v1218_v27 = vpop.f32.mrb[13].mxu0  ;;  %v2041_v29 = vpop.f32.mrb[13].mxu1  ;;  %v2164_v35 = vsel %vm1253_vm4, %v2140_v28, 0.0  ;;  %v2163_v37 = vadd.f32 %v2162_v11, %v2161_v56  ;;  %v1318_v43 = vmul.f32 %v1208_v36, %v1208_v36  ;;  %v1342_v46 = vadd.f32 %v1341_v57, %v1340_v61 }
 0x16f   : > { %1266 = vst.msk [vmem:[%s6461_s11 + $0x60] sm:$0xff] %vm1253_vm4, %v1218_v27  ;;  %4347 = vst.msk [vmem:[%s6461_s11 + $0xe0] sm:$0xff] %vm1253_vm4, %v2041_v29  ;;  %v1291_v47 = vsel %vm1253_vm4, %v4916_v20, 0.0  ;;  %v1290_v48 = vadd.f32 %v1289_v23, %v1288_v22  ;;  %v2111_v54 = vadd.f32 %v2110_v60, %v2109_v7  ;;  %v2112_v55 = vsel %vm1253_vm4, %v2031_v26, 0.0 }
 0x170   : > { %v2142_v58 = vmul.f32 %v5020_v4, %v5020_v4  ;;  %v1343_v59 = vsel %vm1253_vm4, %v1318_v43, 0.0  ;;  %v2141_v63 = vmul.f32 %v2031_v26, %v2031_v26  ;;  %v2165_v0 = vadd.f32 %v2164_v35, %v2163_v37 }
 0x171   : > { %v4922_v1 = vpop.f32.mrb[14].mxu0  ;;  %v5026_v2 = vpop.f32.mrb[14].mxu1  ;;  %v1345_v3 = vsel %vm1253_vm4, %v1319_v12, 0.0  ;;  %v2114_v10 = vsel %vm1253_vm4, %v5020_v4, 0.0  ;;  %v1344_v16 = vadd.f32 %v1343_v59, %v1342_v46  ;;  %v2113_v17 = vadd.f32 %v2112_v55, %v2111_v54 }
 0x172   : > { %1269 = vst.msk [vmem:[%s6461_s11 + $0x78] sm:$0xff] %vm1253_vm4, %v4922_v1  ;;  %4350 = vst.msk [vmem:[%s6461_s11 + $0xf8] sm:$0xff] %vm1253_vm4, %v5026_v2  ;;  %v1228_v21 = vpop.f32.mrb[15].mxu0  ;;  %v2051_v24 = vpop.f32.mrb[15].mxu1  ;;  %v2166_v32 = vsel %vm1253_vm4, %v2141_v63, 0.0  ;;  %v1321_v33 = vmul.f32 %v4919_v31, %v4919_v31  ;;  %v1292_v40 = vadd.f32 %v1291_v47, %v1290_v48  ;;  %v1293_v41 = vsel %vm1253_vm4, %v1218_v27, 0.0 }
 0x173   : > { %1268 = vst.msk [vmem:[%s6461_s11 + $0x70] sm:$0xff] %vm1253_vm4, %v1228_v21  ;;  %4349 = vst.msk [vmem:[%s6461_s11 + $0xf0] sm:$0xff] %vm1253_vm4, %v2051_v24  ;;  %v2167_v44 = vadd.f32 %v2166_v32, %v2165_v0  ;;  %v2144_v45 = vmul.f32 %v5023_v42, %v5023_v42  ;;  %v1320_v49 = vmul.f32 %v1218_v27, %v1218_v27  ;;  %v2168_v62 = vsel %vm1253_vm4, %v2142_v58, 0.0 }
 0x174   : > { %v1346_v53 = vadd.f32 %v1345_v3, %v1344_v16  ;;  %v1294_v6 = vadd.f32 %v1293_v41, %v1292_v40  ;;  %v2115_v8 = vadd.f32 %v2114_v10, %v2113_v17  ;;  %v2116_v9 = vsel %vm1253_vm4, %v2041_v29, 0.0 }
 0x175   : > { %v1295_v13 = vsel %vm1253_vm4, %v4919_v31, 0.0  ;;  %v1347_v14 = vsel %vm1253_vm4, %v1320_v49, 0.0  ;;  %v2143_v15 = vmul.f32 %v2041_v29, %v2041_v29  ;;  %v2169_v19 = vadd.f32 %v2168_v62, %v2167_v44 }
 0x176   : > { %v1349_v20 = vsel %vm1253_vm4, %v1321_v33, 0.0  ;;  %v2118_v4 = vsel %vm1253_vm4, %v5023_v42, 0.0  ;;  %v1348_v5 = vadd.f32 %v1347_v14, %v1346_v53  ;;  %v2117_v18 = vadd.f32 %v2116_v9, %v2115_v8 }
 0x177   : > { %v2172_v25 = vsel %vm1253_vm4, %v2144_v45, 0.0  ;;  %v2170_v30 = vsel %vm1253_vm4, %v2143_v15, 0.0  ;;  %v1296_v36 = vadd.f32 %v1295_v13, %v1294_v6  ;;  %v1297_v26 = vsel %vm1253_vm4, %v1228_v21, 0.0 }
 0x178   : > { %v2171_v28 = vadd.f32 %v2170_v30, %v2169_v19  ;;  %v1323_v34 = vmul.f32 %v4922_v1, %v4922_v1  ;;  %v1322_v38 = vmul.f32 %v1228_v21, %v1228_v21  ;;  %v1350_v39 = vadd.f32 %v1349_v20, %v1348_v5 }
 0x179   : > { %v1299_v50 = vsel %vm1253_vm4, %v4922_v1, 0.0  ;;  %v1298_v51 = vadd.f32 %v1297_v26, %v1296_v36  ;;  %v2119_v52 = vadd.f32 %v2118_v4, %v2117_v18  ;;  %v2120_v56 = vsel %vm1253_vm4, %v2051_v24, 0.0 }
 0x17a   : > { %v2146_v57 = vmul.f32 %v5026_v2, %v5026_v2  ;;  %v1351_v60 = vsel %vm1253_vm4, %v1322_v38, 0.0  ;;  %v2145_v61 = vmul.f32 %v2051_v24, %v2051_v24  ;;  %v2173_v7 = vadd.f32 %v2172_v25, %v2171_v28 }
 0x17b   : > { %v1300_v31 = vadd.f32 %v1299_v50, %v1298_v51  ;;  %v1352_v42 = vadd.f32 %v1351_v60, %v1350_v39  ;;  %v2121_v11 = vadd.f32 %v2120_v56, %v2119_v52  ;;  %v1353_v12 = vsel %vm1253_vm4, %v1323_v34, 0.0 }
 0x17c   : > { %v2122_v22 = vsel %vm1253_vm4, %v5026_v2, 0.0  ;;  %v2174_v23 = vsel %vm1253_vm4, %v2145_v61, 0.0  ;;  %v2176_v43 = vsel %vm1253_vm4, %v2146_v57, 0.0 }
 0x17d   : > { %v1301_v27 = vrot.slane %v1300_v31, 4  ;;  %v1354_v29 = vadd.f32 %v1353_v12, %v1352_v42  ;;  %v2123_v35 = vadd.f32 %v2122_v22, %v2121_v11  ;;  %v2175_v37 = vadd.f32 %v2174_v23, %v2173_v7 }
 0x17f   : > { %v1302_v46 = vadd.f32 %v1301_v27, %v1300_v31  ;;  %v1355_v47 = vrot.slane %v1354_v29, 4  ;;  %v2124_v48 = vrot.slane %v2123_v35, 4  ;;  %v2177_v54 = vadd.f32 %v2176_v43, %v2175_v37 }
 0x181   : > { %v1303_v55 = vrot.slane %v1302_v46, 2  ;;  %v1356_v58 = vadd.f32 %v1355_v47, %v1354_v29  ;;  %v2125_v59 = vadd.f32 %v2124_v48, %v2123_v35  ;;  %v2178_v63 = vrot.slane %v2177_v54, 4 }
 0x183   : > { %v1304_v0 = vadd.f32 %v1303_v55, %v1302_v46  ;;  %v1357_v1 = vrot.slane %v1356_v58, 2  ;;  %v2126_v3 = vrot.slane %v2125_v59, 2  ;;  %v2179_v2 = vadd.f32 %v2178_v63, %v2177_v54 }
 0x185   : > { %v1305_v10 = vrot.slane %v1304_v0, 1  ;;  %v1358_v16 = vadd.f32 %v1357_v1, %v1356_v58  ;;  %v2127_v17 = vadd.f32 %v2126_v3, %v2125_v59  ;;  %v2180_v21 = vrot.slane %v2179_v2, 2 }
 0x187   : > { %v1306_v24 = vadd.f32 %v1305_v10, %v1304_v0  ;;  %v1359_v32 = vrot.slane %v1358_v16, 1  ;;  %v2128_v33 = vrot.slane %v2127_v17, 1  ;;  %v2181_v40 = vadd.f32 %v2180_v21, %v2179_v2 }
 0x189   : > { %v1360_v41 = vadd.f32 %v1359_v32, %v1358_v16  ;;  %v2129_v44 = vadd.f32 %v2128_v33, %v2127_v17  ;;  %v2182_v45 = vrot.slane %v2181_v40, 1 }
 0x18b   : > { %v6591_v49 = vadd.f32 %v2129_v44, %v1306_v24  ;;  %v2183_v53 = vadd.f32 %v2182_v45, %v2181_v40 }
 0x18d   : > { %v6593_v62 = vadd.f32 %v2183_v53, %v1360_v41 }
 0x1d5   : > { %v5109_v6 = vpop.f32.mrb[16].mxu0  ;;  %v5213_v8 = vpop.f32.mrb[16].mxu1 }
 0x1d6   : > { %4424 = vst.msk [vmem:[%s6461_s11 + $0x108] sm:$0xff] %vm1253_vm4, %v5109_v6  ;;  %v2851_v9 = vsel %vm1253_vm4, %v5109_v6, 0.0  ;;  %v2889_v13 = vmul.f32 %v5109_v6, %v5109_v6  ;;  %4512 = vst.msk [vmem:[%s6461_s11 + $0x188] sm:$0xff] %vm1253_vm4, %v5213_v8  ;;  %v3601_v14 = vsel %vm1253_vm4, %v5213_v8, 0.0  ;;  %v3639_v15 = vmul.f32 %v5213_v8, %v5213_v8  ;;  %v2738_v19 = vpop.f32.mrb[17].mxu0  ;;  %v3488_v20 = vpop.f32.mrb[17].mxu1 }
 0x1d7   : > { %4423 = vst.msk [vmem:[%s6461_s11 + $0x100] sm:$0xff] %vm1253_vm4, %v2738_v19  ;;  %v2850_v4 = vsel %vm1253_vm4, %v2738_v19, 0.0  ;;  %v2888_v5 = vmul.f32 %v2738_v19, %v2738_v19  ;;  %4511 = vst.msk [vmem:[%s6461_s11 + $0x180] sm:$0xff] %vm1253_vm4, %v3488_v20  ;;  %v3600_v18 = vsel %vm1253_vm4, %v3488_v20, 0.0  ;;  %v3638_v25 = vmul.f32 %v3488_v20, %v3488_v20 }
 0x1d8   : > { %v2905_v30 = vsel %vm1253_vm4, %v2889_v13, 0.0  ;;  %v3655_v36 = vsel %vm1253_vm4, %v3639_v15, 0.0  ;;  %v2852_v26 = vadd.f32 %v2851_v9, %v2850_v4  ;;  %v3602_v28 = vadd.f32 %v3601_v14, %v3600_v18 }
 0x1d9   : > { %v2904_v34 = vsel %vm1253_vm4, %v2888_v5, 0.0  ;;  %v3654_v38 = vsel %vm1253_vm4, %v3638_v25, 0.0  ;;  %v5112_v39 = vpop.f32.mrb[18].mxu0  ;;  %v5216_v50 = vpop.f32.mrb[18].mxu1 }
 0x1da   : > { %v2906_v51 = vadd.f32 %v2905_v30, %v2904_v34  ;;  %v3656_v52 = vadd.f32 %v3655_v36, %v3654_v38  ;;  %4426 = vst.msk [vmem:[%s6461_s11 + $0x118] sm:$0xff] %vm1253_vm4, %v5112_v39  ;;  %4514 = vst.msk [vmem:[%s6461_s11 + $0x198] sm:$0xff] %vm1253_vm4, %v5216_v50  ;;  %v2748_v56 = vpop.f32.mrb[19].mxu0  ;;  %v3498_v57 = vpop.f32.mrb[19].mxu1  ;;  %v2891_v60 = vmul.f32 %v5112_v39, %v5112_v39  ;;  %v2855_v35 = vsel %vm1253_vm4, %v5112_v39, 0.0 }
 0x1db   : > { %4425 = vst.msk [vmem:[%s6461_s11 + $0x110] sm:$0xff] %vm1253_vm4, %v2748_v56  ;;  %v2853_v61 = vsel %vm1253_vm4, %v2748_v56, 0.0  ;;  %v2890_v7 = vmul.f32 %v2748_v56, %v2748_v56  ;;  %4513 = vst.msk [vmem:[%s6461_s11 + $0x190] sm:$0xff] %vm1253_vm4, %v3498_v57  ;;  %v3641_v31 = vmul.f32 %v5216_v50, %v5216_v50  ;;  %v3603_v11 = vsel %vm1253_vm4, %v3498_v57, 0.0 }
 0x1dc   : > { %v2854_v42 = vadd.f32 %v2853_v61, %v2852_v26  ;;  %v3640_v12 = vmul.f32 %v3498_v57, %v3498_v57  ;;  %v3604_v23 = vadd.f32 %v3603_v11, %v3602_v28  ;;  %v3605_v37 = vsel %vm1253_vm4, %v5216_v50, 0.0 }
 0x1dd   : > { %v2907_v22 = vsel %vm1253_vm4, %v2890_v7, 0.0  ;;  %v5115_v27 = vpop.f32.mrb[20].mxu0  ;;  %v5219_v29 = vpop.f32.mrb[20].mxu1  ;;  %v2909_v54 = vsel %vm1253_vm4, %v2891_v60, 0.0  ;;  %v3659_v63 = vsel %vm1253_vm4, %v3641_v31, 0.0 }
 0x1de   : > { %v2908_v43 = vadd.f32 %v2907_v22, %v2906_v51  ;;  %v3657_v46 = vsel %vm1253_vm4, %v3640_v12, 0.0  ;;  %4428 = vst.msk [vmem:[%s6461_s11 + $0x128] sm:$0xff] %vm1253_vm4, %v5115_v27  ;;  %4516 = vst.msk [vmem:[%s6461_s11 + $0x1a8] sm:$0xff] %vm1253_vm4, %v5219_v29  ;;  %v2758_v47 = vpop.f32.mrb[21].mxu0  ;;  %v3508_v48 = vpop.f32.mrb[21].mxu1  ;;  %v2893_v58 = vmul.f32 %v5115_v27, %v5115_v27  ;;  %v2856_v59 = vadd.f32 %v2855_v35, %v2854_v42 }
 0x1df   : > { %v3658_v55 = vadd.f32 %v3657_v46, %v3656_v52  ;;  %4427 = vst.msk [vmem:[%s6461_s11 + $0x120] sm:$0xff] %vm1253_vm4, %v2758_v47  ;;  %4515 = vst.msk [vmem:[%s6461_s11 + $0x1a0] sm:$0xff] %vm1253_vm4, %v3508_v48  ;;  %v2857_v0 = vsel %vm1253_vm4, %v2758_v47, 0.0  ;;  %v2892_v1 = vmul.f32 %v2758_v47, %v2758_v47  ;;  %v3643_v2 = vmul.f32 %v5219_v29, %v5219_v29 }
 0x1e0   : > { %v2910_v3 = vadd.f32 %v2909_v54, %v2908_v43  ;;  %v2858_v10 = vadd.f32 %v2857_v0, %v2856_v59  ;;  %v3606_v16 = vadd.f32 %v3605_v37, %v3604_v23  ;;  %v3607_v17 = vsel %vm1253_vm4, %v3508_v48, 0.0 }
 0x1e1   : > { %v5118_v21 = vpop.f32.mrb[22].mxu0  ;;  %v5222_v24 = vpop.f32.mrb[22].mxu1  ;;  %v2859_v32 = vsel %vm1253_vm4, %v5115_v27, 0.0  ;;  %v2911_v33 = vsel %vm1253_vm4, %v2892_v1, 0.0  ;;  %v3642_v40 = vmul.f32 %v3508_v48, %v3508_v48  ;;  %v3660_v41 = vadd.f32 %v3659_v63, %v3658_v55 }
 0x1e2   : > { %4430 = vst.msk [vmem:[%s6461_s11 + $0x138] sm:$0xff] %vm1253_vm4, %v5118_v21  ;;  %4518 = vst.msk [vmem:[%s6461_s11 + $0x1b8] sm:$0xff] %vm1253_vm4, %v5222_v24  ;;  %v2768_v44 = vpop.f32.mrb[23].mxu0  ;;  %v3518_v45 = vpop.f32.mrb[23].mxu1  ;;  %v2913_v53 = vsel %vm1253_vm4, %v2893_v58, 0.0  ;;  %v3609_v6 = vsel %vm1253_vm4, %v5219_v29, 0.0  ;;  %v2912_v8 = vadd.f32 %v2911_v33, %v2910_v3  ;;  %v3608_v9 = vadd.f32 %v3607_v17, %v3606_v16 }
 0x1e3   : > { %4429 = vst.msk [vmem:[%s6461_s11 + $0x130] sm:$0xff] %vm1253_vm4, %v2768_v44  ;;  %4517 = vst.msk [vmem:[%s6461_s11 + $0x1b0] sm:$0xff] %vm1253_vm4, %v3518_v45  ;;  %v3661_v13 = vsel %vm1253_vm4, %v3642_v40, 0.0  ;;  %v2895_v14 = vmul.f32 %v5118_v21, %v5118_v21  ;;  %v2860_v15 = vadd.f32 %v2859_v32, %v2858_v10  ;;  %v2861_v19 = vsel %vm1253_vm4, %v2768_v44, 0.0 }
 0x1e4   : > { %v3663_v20 = vsel %vm1253_vm4, %v3643_v2, 0.0  ;;  %v3662_v4 = vadd.f32 %v3661_v13, %v3660_v41  ;;  %v2894_v5 = vmul.f32 %v2768_v44, %v2768_v44  ;;  %v2914_v18 = vadd.f32 %v2913_v53, %v2912_v8 }
 0x1e5   : > { %v5121_v25 = vpop.f32.mrb[24].mxu0  ;;  %v5225_v30 = vpop.f32.mrb[24].mxu1  ;;  %v3645_v36 = vmul.f32 %v5222_v24, %v5222_v24  ;;  %v2862_v26 = vadd.f32 %v2861_v19, %v2860_v15  ;;  %v3610_v28 = vadd.f32 %v3609_v6, %v3608_v9  ;;  %v3611_v34 = vsel %vm1253_vm4, %v3518_v45, 0.0 }
 0x1e6   : > { %4432 = vst.msk [vmem:[%s6461_s11 + $0x148] sm:$0xff] %vm1253_vm4, %v5121_v25  ;;  %4520 = vst.msk [vmem:[%s6461_s11 + $0x1c8] sm:$0xff] %vm1253_vm4, %v5225_v30  ;;  %v2778_v38 = vpop.f32.mrb[25].mxu0  ;;  %v3528_v39 = vpop.f32.mrb[25].mxu1  ;;  %v2863_v50 = vsel %vm1253_vm4, %v5118_v21, 0.0  ;;  %v2915_v51 = vsel %vm1253_vm4, %v2894_v5, 0.0  ;;  %v3644_v52 = vmul.f32 %v3518_v45, %v3518_v45  ;;  %v3664_v56 = vadd.f32 %v3663_v20, %v3662_v4 }
 0x1e7   : > { %4431 = vst.msk [vmem:[%s6461_s11 + $0x140] sm:$0xff] %vm1253_vm4, %v2778_v38  ;;  %4519 = vst.msk [vmem:[%s6461_s11 + $0x1c0] sm:$0xff] %vm1253_vm4, %v3528_v39  ;;  %v2917_v57 = vsel %vm1253_vm4, %v2895_v14, 0.0  ;;  %v3613_v60 = vsel %vm1253_vm4, %v5222_v24, 0.0  ;;  %v2916_v61 = vadd.f32 %v2915_v51, %v2914_v18  ;;  %v3612_v7 = vadd.f32 %v3611_v34, %v3610_v28 }
 0x1e8   : > { %v3665_v31 = vsel %vm1253_vm4, %v3644_v52, 0.0  ;;  %v2897_v42 = vmul.f32 %v5121_v25, %v5121_v25  ;;  %v2864_v11 = vadd.f32 %v2863_v50, %v2862_v26  ;;  %v2865_v12 = vsel %vm1253_vm4, %v2778_v38, 0.0 }
 0x1e9   : > { %v5124_v22 = vpop.f32.mrb[26].mxu0  ;;  %v5228_v23 = vpop.f32.mrb[26].mxu1  ;;  %v3667_v27 = vsel %vm1253_vm4, %v3645_v36, 0.0  ;;  %v3666_v29 = vadd.f32 %v3665_v31, %v3664_v56  ;;  %v2896_v35 = vmul.f32 %v2778_v38, %v2778_v38  ;;  %v2918_v37 = vadd.f32 %v2917_v57, %v2916_v61 }
 0x1ea   : > { %4434 = vst.msk [vmem:[%s6461_s11 + $0x158] sm:$0xff] %vm1253_vm4, %v5124_v22  ;;  %4522 = vst.msk [vmem:[%s6461_s11 + $0x1d8] sm:$0xff] %vm1253_vm4, %v5228_v23  ;;  %v2788_v43 = vpop.f32.mrb[27].mxu0  ;;  %v3538_v46 = vpop.f32.mrb[27].mxu1  ;;  %v3647_v47 = vmul.f32 %v5225_v30, %v5225_v30  ;;  %v2866_v48 = vadd.f32 %v2865_v12, %v2864_v11  ;;  %v3614_v54 = vadd.f32 %v3613_v60, %v3612_v7  ;;  %v3615_v55 = vsel %vm1253_vm4, %v3528_v39, 0.0 }
 0x1eb   : > { %4433 = vst.msk [vmem:[%s6461_s11 + $0x150] sm:$0xff] %vm1253_vm4, %v2788_v43  ;;  %4521 = vst.msk [vmem:[%s6461_s11 + $0x1d0] sm:$0xff] %vm1253_vm4, %v3538_v46  ;;  %v2867_v58 = vsel %vm1253_vm4, %v5121_v25, 0.0  ;;  %v2919_v59 = vsel %vm1253_vm4, %v2896_v35, 0.0  ;;  %v3646_v63 = vmul.f32 %v3528_v39, %v3528_v39  ;;  %v3668_v0 = vadd.f32 %v3667_v27, %v3666_v29 }
 0x1ec   : > { %v2921_v1 = vsel %vm1253_vm4, %v2897_v42, 0.0  ;;  %v3617_v3 = vsel %vm1253_vm4, %v5225_v30, 0.0  ;;  %v2920_v2 = vadd.f32 %v2919_v59, %v2918_v37  ;;  %v3616_v10 = vadd.f32 %v3615_v55, %v3614_v54 }
 0x1ed   : > { %v5127_v16 = vpop.f32.mrb[28].mxu0  ;;  %v5231_v17 = vpop.f32.mrb[28].mxu1  ;;  %v3669_v21 = vsel %vm1253_vm4, %v3646_v63, 0.0  ;;  %v2899_v24 = vmul.f32 %v5124_v22, %v5124_v22  ;;  %v2868_v32 = vadd.f32 %v2867_v58, %v2866_v48  ;;  %v2869_v33 = vsel %vm1253_vm4, %v2788_v43, 0.0 }
 0x1ee   : > { %4436 = vst.msk [vmem:[%s6461_s11 + $0x168] sm:$0xff] %vm1253_vm4, %v5127_v16  ;;  %4524 = vst.msk [vmem:[%s6461_s11 + $0x1e8] sm:$0xff] %vm1253_vm4, %v5231_v17  ;;  %v2798_v40 = vpop.f32.mrb[29].mxu0  ;;  %v3548_v41 = vpop.f32.mrb[29].mxu1  ;;  %v3671_v44 = vsel %vm1253_vm4, %v3647_v47, 0.0  ;;  %v3670_v45 = vadd.f32 %v3669_v21, %v3668_v0  ;;  %v2898_v53 = vmul.f32 %v2788_v43, %v2788_v43  ;;  %v2922_v6 = vadd.f32 %v2921_v1, %v2920_v2 }
 0x1ef   : > { %4435 = vst.msk [vmem:[%s6461_s11 + $0x160] sm:$0xff] %vm1253_vm4, %v2798_v40  ;;  %4523 = vst.msk [vmem:[%s6461_s11 + $0x1e0] sm:$0xff] %vm1253_vm4, %v3548_v41  ;;  %v2871_v8 = vsel %vm1253_vm4, %v5124_v22, 0.0  ;;  %v2870_v9 = vadd.f32 %v2869_v33, %v2868_v32  ;;  %v3618_v13 = vadd.f32 %v3617_v3, %v3616_v10  ;;  %v3619_v14 = vsel %vm1253_vm4, %v3538_v46, 0.0 }
 0x1f0   : > { %v3649_v15 = vmul.f32 %v5228_v23, %v5228_v23  ;;  %v2923_v19 = vsel %vm1253_vm4, %v2898_v53, 0.0  ;;  %v3648_v20 = vmul.f32 %v3538_v46, %v3538_v46  ;;  %v3672_v4 = vadd.f32 %v3671_v44, %v3670_v45 }
 0x1f1   : > { %v5130_v5 = vpop.f32.mrb[30].mxu0  ;;  %v5234_v18 = vpop.f32.mrb[30].mxu1  ;;  %v2925_v25 = vsel %vm1253_vm4, %v2899_v24, 0.0  ;;  %v3621_v30 = vsel %vm1253_vm4, %v5228_v23, 0.0  ;;  %v2924_v36 = vadd.f32 %v2923_v19, %v2922_v6  ;;  %v3620_v26 = vadd.f32 %v3619_v14, %v3618_v13 }
 0x1f2   : > { %4438 = vst.msk [vmem:[%s6461_s11 + $0x178] sm:$0xff] %vm1253_vm4, %v5130_v5  ;;  %4526 = vst.msk [vmem:[%s6461_s11 + $0x1f8] sm:$0xff] %vm1253_vm4, %v5234_v18  ;;  %v2808_v28 = vpop.f32.mrb[31].mxu0  ;;  %v3558_v34 = vpop.f32.mrb[31].mxu1  ;;  %v3673_v38 = vsel %vm1253_vm4, %v3648_v20, 0.0  ;;  %v2901_v39 = vmul.f32 %v5127_v16, %v5127_v16  ;;  %v2872_v50 = vadd.f32 %v2871_v8, %v2870_v9  ;;  %v2873_v51 = vsel %vm1253_vm4, %v2798_v40, 0.0 }
 0x1f3   : > { %4437 = vst.msk [vmem:[%s6461_s11 + $0x170] sm:$0xff] %vm1253_vm4, %v2808_v28  ;;  %4525 = vst.msk [vmem:[%s6461_s11 + $0x1f0] sm:$0xff] %vm1253_vm4, %v3558_v34  ;;  %v3674_v52 = vadd.f32 %v3673_v38, %v3672_v4  ;;  %v3651_v56 = vmul.f32 %v5231_v17, %v5231_v17  ;;  %v2900_v57 = vmul.f32 %v2798_v40, %v2798_v40  ;;  %v3675_v61 = vsel %vm1253_vm4, %v3649_v15, 0.0 }
 0x1f4   : > { %v2926_v60 = vadd.f32 %v2925_v25, %v2924_v36  ;;  %v2874_v7 = vadd.f32 %v2873_v51, %v2872_v50  ;;  %v3622_v31 = vadd.f32 %v3621_v30, %v3620_v26  ;;  %v3623_v42 = vsel %vm1253_vm4, %v3548_v41, 0.0 }
 0x1f5   : > { %v2875_v11 = vsel %vm1253_vm4, %v5127_v16, 0.0  ;;  %v2927_v12 = vsel %vm1253_vm4, %v2900_v57, 0.0  ;;  %v3650_v22 = vmul.f32 %v3548_v41, %v3548_v41  ;;  %v3676_v23 = vadd.f32 %v3675_v61, %v3674_v52 }
 0x1f6   : > { %v2929_v27 = vsel %vm1253_vm4, %v2901_v39, 0.0  ;;  %v3625_v29 = vsel %vm1253_vm4, %v5231_v17, 0.0  ;;  %v2928_v35 = vadd.f32 %v2927_v12, %v2926_v60  ;;  %v3624_v37 = vadd.f32 %v3623_v42, %v3622_v31  ;;  %v3875_v12 = vld [vmem:[%s6461_s11 + $0x10] sm:$0xff] (%p5624_p5) }
 0x1f7   : > { %v3679_v43 = vsel %vm1253_vm4, %v3651_v56, 0.0  ;;  %v3677_v46 = vsel %vm1253_vm4, %v3650_v22, 0.0  ;;  %v2876_v47 = vadd.f32 %v2875_v11, %v2874_v7  ;;  %v2877_v48 = vsel %vm1253_vm4, %v2808_v28, 0.0  ;;  %v3877_v22 = vld [vmem:[%s6461_s11 + $0x18] sm:$0xff] (%p5624_p5)  ;;  %3876 = vst [vmem:[%s6749_s21 + $0x10] sm:$0xff] (%p5624_p5), %v3875_v12 }
 0x1f8   : > { %v3678_v54 = vadd.f32 %v3677_v46, %v3676_v23  ;;  %v2903_v55 = vmul.f32 %v5130_v5, %v5130_v5  ;;  %v2902_v58 = vmul.f32 %v2808_v28, %v2808_v28  ;;  %v2930_v59 = vadd.f32 %v2929_v27, %v2928_v35  ;;  %v3879_v23 = vld [vmem:[%s6461_s11 + $0x20] sm:$0xff] (%p5624_p5)  ;;  %v3881_v27 = vld [vmem:[%s6461_s11 + $0x28] sm:$0xff] (%p5624_p5)  ;;  %v3885_v35 = vld [vmem:[%s6461_s11 + $0x38] sm:$0xff] (%p5624_p5)  ;;  %3878 = vst [vmem:[%s6749_s21 + $0x18] sm:$0xff] (%p5624_p5), %v3877_v22 }
 0x1f9   : > { %v2879_v63 = vsel %vm1253_vm4, %v5130_v5, 0.0  ;;  %v2878_v0 = vadd.f32 %v2877_v48, %v2876_v47  ;;  %v3626_v1 = vadd.f32 %v3625_v29, %v3624_v37  ;;  %v3627_v3 = vsel %vm1253_vm4, %v3558_v34, 0.0  ;;  %v3883_v29 = vld [vmem:[%s6461_s11 + $0x30] sm:$0xff] (%p5624_p5)  ;;  %v3887_v37 = vld [vmem:[%s6461_s11 + $0x40] sm:$0xff] (%p5624_p5)  ;;  %v3893_v47 = vld [vmem:[%s6461_s11 + $0x58] sm:$0xff] (%p5624_p5)  ;;  %3880 = vst [vmem:[%s6749_s21 + $0x20] sm:$0xff] (%p5624_p5), %v3879_v23 }
 0x1fa   : > { %v3653_v2 = vmul.f32 %v5234_v18, %v5234_v18  ;;  %v2931_v10 = vsel %vm1253_vm4, %v2902_v58, 0.0  ;;  %v3652_v16 = vmul.f32 %v3558_v34, %v3558_v34  ;;  %v3680_v17 = vadd.f32 %v3679_v43, %v3678_v54  ;;  %v3889_v43 = vld [vmem:[%s6461_s11 + $0x48] sm:$0xff] (%p5624_p5)  ;;  %v3891_v46 = vld [vmem:[%s6461_s11 + $0x50] sm:$0xff] (%p5624_p5)  ;;  %3882 = vst [vmem:[%s6749_s21 + $0x28] sm:$0xff] (%p5624_p5), %v3881_v27  ;;  %3884 = vst [vmem:[%s6749_s21 + $0x30] sm:$0xff] (%p5624_p5), %v3883_v29 }
 0x1fb   : > { %v2880_v21 = vadd.f32 %v2879_v63, %v2878_v0  ;;  %v2932_v24 = vadd.f32 %v2931_v10, %v2930_v59  ;;  %v3628_v32 = vadd.f32 %v3627_v3, %v3626_v1  ;;  %v2933_v33 = vsel %vm1253_vm4, %v2903_v55, 0.0  ;;  %3886 = vst [vmem:[%s6749_s21 + $0x38] sm:$0xff] (%p5624_p5), %v3885_v35  ;;  %3888 = vst [vmem:[%s6749_s21 + $0x40] sm:$0xff] (%p5624_p5), %v3887_v37  ;;  %v3895_v48 = vld [vmem:[%s6461_s11 + $0x60] sm:$0xff] (%p5624_p5)  ;;  %v3897_v54 = vld [vmem:[%s6461_s11 + $0x68] sm:$0xff] (%p5624_p5) }
 0x1fc   : > { %v3629_v40 = vsel %vm1253_vm4, %v5234_v18, 0.0  ;;  %v3681_v41 = vsel %vm1253_vm4, %v3652_v16, 0.0  ;;  %v3683_v8 = vsel %vm1253_vm4, %v3653_v2, 0.0  ;;  %3890 = vst [vmem:[%s6749_s21 + $0x48] sm:$0xff] (%p5624_p5), %v3889_v43  ;;  %3892 = vst [vmem:[%s6749_s21 + $0x50] sm:$0xff] (%p5624_p5), %v3891_v46  ;;  %v3899_v55 = vld [vmem:[%s6461_s11 + $0x70] sm:$0xff] (%p5624_p5) }
 0x1fd   : > { %v2881_v44 = vrot.slane %v2880_v21, 4  ;;  %v2934_v45 = vadd.f32 %v2933_v33, %v2932_v24  ;;  %v3630_v53 = vadd.f32 %v3629_v40, %v3628_v32  ;;  %v3682_v6 = vadd.f32 %v3681_v41, %v3680_v17  ;;  %3894 = vst [vmem:[%s6749_s21 + $0x58] sm:$0xff] (%p5624_p5), %v3893_v47  ;;  %3896 = vst [vmem:[%s6749_s21 + $0x60] sm:$0xff] (%p5624_p5), %v3895_v48  ;;  %v3901_v58 = vld [vmem:[%s6461_s11 + $0x78] sm:$0xff] (%p5624_p5)  ;;  %v3903_v59 = vld [vmem:[%s6461_s11 + $0x80] sm:$0xff] (%p5624_p5) }
 0x1fe   : > { %3898 = vst [vmem:[%s6749_s21 + $0x68] sm:$0xff] (%p5624_p5), %v3897_v54  ;;  %3900 = vst [vmem:[%s6749_s21 + $0x70] sm:$0xff] (%p5624_p5), %v3899_v55  ;;  %v3905_v63 = vld [vmem:[%s6461_s11 + $0x88] sm:$0xff] (%p5624_p5)  ;;  %v3907_v0 = vld [vmem:[%s6461_s11 + $0x90] sm:$0xff] (%p5624_p5) }
 0x1ff   : > { %v2882_v9 = vadd.f32 %v2881_v44, %v2880_v21  ;;  %v2935_v13 = vrot.slane %v2934_v45, 4  ;;  %v3631_v14 = vrot.slane %v3630_v53, 4  ;;  %v3684_v15 = vadd.f32 %v3683_v8, %v3682_v6  ;;  %3902 = vst [vmem:[%s6749_s21 + $0x78] sm:$0xff] (%p5624_p5), %v3901_v58  ;;  %3904 = vst [vmem:[%s6749_s21 + $0x100] sm:$0xff] (%p5624_p5), %v3903_v59  ;;  %v3909_v1 = vld [vmem:[%s6461_s11 + $0x98] sm:$0xff] (%p5624_p5)  ;;  %v3911_v3 = vld [vmem:[%s6461_s11 + $0xa0] sm:$0xff] (%p5624_p5) }
 0x200   : > { %3906 = vst [vmem:[%s6749_s21 + $0x108] sm:$0xff] (%p5624_p5), %v3905_v63  ;;  %3908 = vst [vmem:[%s6749_s21 + $0x110] sm:$0xff] (%p5624_p5), %v3907_v0  ;;  %v3913_v2 = vld [vmem:[%s6461_s11 + $0xa8] sm:$0xff] (%p5624_p5)  ;;  %v3915_v10 = vld [vmem:[%s6461_s11 + $0xb0] sm:$0xff] (%p5624_p5) }
 0x201   : > { %v2883_v19 = vrot.slane %v2882_v9, 2  ;;  %v2936_v20 = vadd.f32 %v2935_v13, %v2934_v45  ;;  %v3632_v4 = vadd.f32 %v3631_v14, %v3630_v53  ;;  %v3685_v5 = vrot.slane %v3684_v15, 4  ;;  %3910 = vst [vmem:[%s6749_s21 + $0x118] sm:$0xff] (%p5624_p5), %v3909_v1  ;;  %3912 = vst [vmem:[%s6749_s21 + $0x120] sm:$0xff] (%p5624_p5), %v3911_v3  ;;  %v3917_v16 = vld [vmem:[%s6461_s11 + $0xb8] sm:$0xff] (%p5624_p5)  ;;  %v3919_v17 = vld [vmem:[%s6461_s11 + $0xc0] sm:$0xff] (%p5624_p5) }
 0x202   : > { %3914 = vst [vmem:[%s6749_s21 + $0x128] sm:$0xff] (%p5624_p5), %v3913_v2  ;;  %3916 = vst [vmem:[%s6749_s21 + $0x130] sm:$0xff] (%p5624_p5), %v3915_v10  ;;  %v3921_v21 = vld [vmem:[%s6461_s11 + $0xc8] sm:$0xff] (%p5624_p5)  ;;  %v3923_v24 = vld [vmem:[%s6461_s11 + $0xd0] sm:$0xff] (%p5624_p5) }
 0x203   : > { %v2884_v18 = vadd.f32 %v2883_v19, %v2882_v9  ;;  %v2937_v25 = vrot.slane %v2936_v20, 2  ;;  %v3633_v30 = vrot.slane %v3632_v4, 2  ;;  %v3686_v36 = vadd.f32 %v3685_v5, %v3684_v15  ;;  %3918 = vst [vmem:[%s6749_s21 + $0x138] sm:$0xff] (%p5624_p5), %v3917_v16  ;;  %3920 = vst [vmem:[%s6749_s21 + $0x140] sm:$0xff] (%p5624_p5), %v3919_v17  ;;  %v3925_v32 = vld [vmem:[%s6461_s11 + $0xd8] sm:$0xff] (%p5624_p5)  ;;  %v3927_v33 = vld [vmem:[%s6461_s11 + $0xe0] sm:$0xff] (%p5624_p5) }
 0x204   : > { %3922 = vst [vmem:[%s6749_s21 + $0x148] sm:$0xff] (%p5624_p5), %v3921_v21  ;;  %3924 = vst [vmem:[%s6749_s21 + $0x150] sm:$0xff] (%p5624_p5), %v3923_v24  ;;  %v3929_v40 = vld [vmem:[%s6461_s11 + $0xe8] sm:$0xff] (%p5624_p5)  ;;  %v3931_v41 = vld [vmem:[%s6461_s11 + $0xf0] sm:$0xff] (%p5624_p5) }
 0x205   : > { %v2885_v26 = vrot.slane %v2884_v18, 1  ;;  %v2938_v28 = vadd.f32 %v2937_v25, %v2936_v20  ;;  %v3634_v34 = vadd.f32 %v3633_v30, %v3632_v4  ;;  %v3687_v38 = vrot.slane %v3686_v36, 2  ;;  %3926 = vst [vmem:[%s6749_s21 + $0x158] sm:$0xff] (%p5624_p5), %v3925_v32  ;;  %3928 = vst [vmem:[%s6749_s21 + $0x160] sm:$0xff] (%p5624_p5), %v3927_v33  ;;  %v3933_v44 = vld [vmem:[%s6461_s11 + $0xf8] sm:$0xff] (%p5624_p5)  ;;  %v3935_v45 = vld [vmem:[%s6461_s11 + $0x100] sm:$0xff] (%p5624_p5) }
 0x206   : > { %3930 = vst [vmem:[%s6749_s21 + $0x168] sm:$0xff] (%p5624_p5), %v3929_v40  ;;  %3932 = vst [vmem:[%s6749_s21 + $0x170] sm:$0xff] (%p5624_p5), %v3931_v41  ;;  %v3937_v53 = vld [vmem:[%s6461_s11 + $0x108] sm:$0xff] (%p5624_p5)  ;;  %v3939_v6 = vld [vmem:[%s6461_s11 + $0x110] sm:$0xff] (%p5624_p5) }
 0x207   : > { %v2886_v39 = vadd.f32 %v2885_v26, %v2884_v18  ;;  %v2939_v50 = vrot.slane %v2938_v28, 1  ;;  %v3635_v51 = vrot.slane %v3634_v34, 1  ;;  %v3688_v52 = vadd.f32 %v3687_v38, %v3686_v36  ;;  %3934 = vst [vmem:[%s6749_s21 + $0x178] sm:$0xff] (%p5624_p5), %v3933_v44  ;;  %3936 = vst [vmem:[%s6749_s21 + $0x200] sm:$0xff] (%p5624_p5), %v3935_v45  ;;  %v3941_v8 = vld [vmem:[%s6461_s11 + $0x118] sm:$0xff] (%p5624_p5)  ;;  %v3943_v9 = vld [vmem:[%s6461_s11 + $0x120] sm:$0xff] (%p5624_p5) }
 0x208   : > { %3938 = vst [vmem:[%s6749_s21 + $0x208] sm:$0xff] (%p5624_p5), %v3937_v53  ;;  %3940 = vst [vmem:[%s6749_s21 + $0x210] sm:$0xff] (%p5624_p5), %v3939_v6  ;;  %v3945_v13 = vld [vmem:[%s6461_s11 + $0x128] sm:$0xff] (%p5624_p5)  ;;  %v3947_v14 = vld [vmem:[%s6461_s11 + $0x130] sm:$0xff] (%p5624_p5) }
 0x209   : > { %v2887_v56 = vadd.f32 %v2886_v39, %v6591_v49  ;;  %v2940_v57 = vadd.f32 %v2939_v50, %v2938_v28  ;;  %v3636_v60 = vadd.f32 %v3635_v51, %v3634_v34  ;;  %v3689_v61 = vrot.slane %v3688_v52, 1  ;;  %3711 = sbr.rel (!%p5624_p5) target bundleno = 538 (0x21a), region = 40  ;;  %v3871_v49 = vld [vmem:[%s6461_s11] sm:$0xff] (%p5624_p5)  ;;  %3942 = vst [vmem:[%s6749_s21 + $0x218] sm:$0xff] (%p5624_p5), %v3941_v8  ;;  %3944 = vst [vmem:[%s6749_s21 + $0x220] sm:$0xff] (%p5624_p5), %v3943_v9  ;;  %v3949_v15 = vld [vmem:[%s6461_s11 + $0x138] sm:$0xff] (%p5624_p5) }
 0x20a   : > { %3872 = vst [vmem:[%s6749_s21] sm:$0xff] (%p5624_p5), %v3871_v49  ;;  %3946 = vst [vmem:[%s6749_s21 + $0x228] sm:$0xff] (%p5624_p5), %v3945_v13  ;;  %v3951_v19 = vld [vmem:[%s6461_s11 + $0x140] sm:$0xff] (%p5624_p5)  ;;  %v3953_v20 = vld [vmem:[%s6461_s11 + $0x148] sm:$0xff] (%p5624_p5) }
 0x20b   : > { %v2941_v7 = vadd.f32 %v2940_v57, %v6593_v62  ;;  %v3637_v31 = vadd.f32 %v3636_v60, %v2887_v56  ;;  %v3690_v42 = vadd.f32 %v3689_v61, %v3688_v52  ;;  %v3873_v62 = vld [vmem:[%s6461_s11 + $0x8] sm:$0xff] (%p5624_p5)  ;;  %3948 = vst [vmem:[%s6749_s21 + $0x230] sm:$0xff] (%p5624_p5), %v3947_v14  ;;  %3950 = vst [vmem:[%s6749_s21 + $0x238] sm:$0xff] (%p5624_p5), %v3949_v15  ;;  %v3955_v4 = vld [vmem:[%s6461_s11 + $0x150] sm:$0xff] (%p5624_p5) }
 0x20c   : > { %3874 = vst [vmem:[%s6749_s21 + $0x8] sm:$0xff] (%p5624_p5), %v3873_v62  ;;  %3952 = vst [vmem:[%s6749_s21 + $0x240] sm:$0xff] (%p5624_p5), %v3951_v19  ;;  %v3957_v5 = vld [vmem:[%s6461_s11 + $0x158] sm:$0xff] (%p5624_p5)  ;;  %v3959_v18 = vld [vmem:[%s6461_s11 + $0x160] sm:$0xff] (%p5624_p5) }
 0x20d   : > { %v3691_v11 = vadd.f32 %v3690_v42, %v2941_v7  ;;  %3693 = vst.msk [vmem:[%s435_s16] sm:$0x1] %vm3692_vm5, %v3637_v31  ;;  %3954 = vst [vmem:[%s6749_s21 + $0x248] sm:$0xff] (%p5624_p5), %v3953_v20  ;;  %v3961_v25 = vld [vmem:[%s6461_s11 + $0x168] sm:$0xff] (%p5624_p5)  ;;  %v3963_v30 = vld [vmem:[%s6461_s11 + $0x170] sm:$0xff] (%p5624_p5) }
 0x20e   : > { %3956 = vst [vmem:[%s6749_s21 + $0x250] sm:$0xff] (%p5624_p5), %v3955_v4  ;;  %3958 = vst [vmem:[%s6749_s21 + $0x258] sm:$0xff] (%p5624_p5), %v3957_v5  ;;  %v3965_v36 = vld [vmem:[%s6461_s11 + $0x178] sm:$0xff] (%p5624_p5)  ;;  %v3967_v26 = vld [vmem:[%s6461_s11 + $0x180] sm:$0xff] (%p5624_p5) }
 0x20f   : > { %3694 = vst.msk [vmem:[%s442_s19] sm:$0x1] %vm3692_vm5, %v3691_v11  ;;  %3960 = vst [vmem:[%s6749_s21 + $0x260] sm:$0xff] (%p5624_p5), %v3959_v18  ;;  %v3969_v28 = vld [vmem:[%s6461_s11 + $0x188] sm:$0xff] (%p5624_p5)  ;;  %v3971_v34 = vld [vmem:[%s6461_s11 + $0x190] sm:$0xff] (%p5624_p5) }
 0x210   : > { %3962 = vst [vmem:[%s6749_s21 + $0x268] sm:$0xff] %v3961_v25  ;;  %3964 = vst [vmem:[%s6749_s21 + $0x270] sm:$0xff] %v3963_v30  ;;  %v3973_v38 = vld [vmem:[%s6461_s11 + $0x198] sm:$0xff]  ;;  %v3975_v39 = vld [vmem:[%s6461_s11 + $0x1a0] sm:$0xff] }
 0x211   : > { %3966 = vst [vmem:[%s6749_s21 + $0x278] sm:$0xff] %v3965_v36  ;;  %3968 = vst [vmem:[%s6749_s21 + $0x300] sm:$0xff] %v3967_v26  ;;  %v3977_v50 = vld [vmem:[%s6461_s11 + $0x1a8] sm:$0xff]  ;;  %v3979_v51 = vld [vmem:[%s6461_s11 + $0x1b0] sm:$0xff] }
 0x212   : > { %3970 = vst [vmem:[%s6749_s21 + $0x308] sm:$0xff] %v3969_v28  ;;  %3972 = vst [vmem:[%s6749_s21 + $0x310] sm:$0xff] %v3971_v34  ;;  %v3981_v52 = vld [vmem:[%s6461_s11 + $0x1b8] sm:$0xff]  ;;  %v3983_v56 = vld [vmem:[%s6461_s11 + $0x1c0] sm:$0xff] }
 0x213   : > { %3974 = vst [vmem:[%s6749_s21 + $0x318] sm:$0xff] %v3973_v38  ;;  %3976 = vst [vmem:[%s6749_s21 + $0x320] sm:$0xff] %v3975_v39  ;;  %v3985_v57 = vld [vmem:[%s6461_s11 + $0x1c8] sm:$0xff]  ;;  %v3987_v60 = vld [vmem:[%s6461_s11 + $0x1d0] sm:$0xff] }
 0x214   : > { %3978 = vst [vmem:[%s6749_s21 + $0x328] sm:$0xff] %v3977_v50  ;;  %3980 = vst [vmem:[%s6749_s21 + $0x330] sm:$0xff] %v3979_v51  ;;  %v3989_v61 = vld [vmem:[%s6461_s11 + $0x1d8] sm:$0xff]  ;;  %v3991_v7 = vld [vmem:[%s6461_s11 + $0x1e0] sm:$0xff] }
 0x215   : > { %3982 = vst [vmem:[%s6749_s21 + $0x338] sm:$0xff] %v3981_v52  ;;  %3984 = vst [vmem:[%s6749_s21 + $0x340] sm:$0xff] %v3983_v56  ;;  %v3993_v31 = vld [vmem:[%s6461_s11 + $0x1e8] sm:$0xff]  ;;  %v3995_v42 = vld [vmem:[%s6461_s11 + $0x1f0] sm:$0xff] }
 0x216   : > { %3986 = vst [vmem:[%s6749_s21 + $0x348] sm:$0xff] %v3985_v57  ;;  %3988 = vst [vmem:[%s6749_s21 + $0x350] sm:$0xff] %v3987_v60  ;;  %v3997_v11 = vld [vmem:[%s6461_s11 + $0x1f8] sm:$0xff] }
 0x217   : > { %3990 = vst [vmem:[%s6749_s21 + $0x358] sm:$0xff] %v3989_v61  ;;  %3992 = vst [vmem:[%s6749_s21 + $0x360] sm:$0xff] %v3991_v7 }
 0x218   : > { %3994 = vst [vmem:[%s6749_s21 + $0x368] sm:$0xff] %v3993_v31  ;;  %3996 = vst [vmem:[%s6749_s21 + $0x370] sm:$0xff] %v3995_v42 }
 0x219   : > { %3998 = vst [vmem:[%s6749_s21 + $0x378] sm:$0xff] %v3997_v11 }
 0x21a PF: > { %s17_s27 = sadd.s32 1, %s5541_s27   ;;  %s6899_s21 = smov %s5521_s22 }
 0x21b   : > { %p14_p0 = scmp.ge.s32.totalorder %s17_s27, 6   ;;  %s6900_s22 = smov %s5635_s12 }
 0x21c   : > { %s6901_s23 = smov %s5533_s25  ;;  %s6902_s24 = smov %s5537_s26 }
 0x21d   : > { %s6903_s25 = smov %s6906_s28  ;;  %s6904_s26 = smov %s6910_s29 }
 0x21e   :  { %16 = sbr.rel (!%p14_p0) target bundleno = 4 (0x4), region = 152 }

</bundles_post_ra>
